<compile_context>
chip_gen: v6e
topology: v6e:2x2x1
jax: 0.10.0
libtpu: 0.0.40
codegen_flags: <defaults>
</compile_context>

<pallas_src>
import functools

import jax
import jax.numpy as jnp
from jax.experimental import pallas as pl
from jax.experimental.pallas import tpu as pltpu


# ----------------------------- small helpers --------------------------------

def _round_up(x, m):
    return (x + m - 1) // m * m


def _pad_to(a, shape):
    pads = [(0, s - d) for d, s in zip(a.shape, shape)]
    if all(p == (0, 0) for p in pads):
        return a
    return jnp.pad(a, pads)


def _vmem_limit(block_bytes):
    # resident blocks x2 (double-buffer headroom) + slack, capped below the
    # smallest physical VMEM (v7x: 64 MiB).
    return int(min(2 * block_bytes + (4 << 20), 64 << 20))


# ----------------------- kernel 1: LSTM recurrence ---------------------------

def _lstm_kernel(x_ref, wih_ref, whh_ref, b_ref, h_out_ref, *, seq_len, hidden):
    Bp = x_ref.shape[1]
    H = hidden

    # Hoisted out of the time loop: weight loads and the bias broadcast
    # (broadcast_in_dim is not CSE'd across loop iterations).
    w_ih = wih_ref[...]                                   # (Ep, 4H) bf16
    w_hh = whh_ref[...]                                   # (Hp, 4H) bf16
    bias = jnp.broadcast_to(b_ref[...], (Bp, 4 * H)).astype(jnp.float32)

    def step(t, carry):
        h_prev, c_prev = carry                            # f32 loop carries (vregs)
        x_t = x_ref[t]                                    # (Bp, Ep) bf16
        gates = (jnp.dot(x_t, w_ih, preferred_element_type=jnp.float32)
                 + jnp.dot(h_prev.astype(w_hh.dtype), w_hh,
                           preferred_element_type=jnp.float32)
                 + bias)                                  # (Bp, 4H) f32; order i,f,g,o
        # H is a multiple of 128 -> lane-aligned slices (free views, no XLU shuffles)
        i_g = jax.nn.sigmoid(gates[:, 0 * H:1 * H])
        f_g = jax.nn.sigmoid(gates[:, 1 * H:2 * H])
        g_g = jnp.tanh(gates[:, 2 * H:3 * H])
        o_g = jax.nn.sigmoid(gates[:, 3 * H:4 * H])
        c_new = f_g * c_prev + i_g * g_g
        h_new = o_g * jnp.tanh(c_new)
        h_out_ref[t] = h_new.astype(h_out_ref.dtype)      # bf16 store (FC operand)
        return (h_new, c_new)

    h0 = jnp.zeros((Bp, H), jnp.float32)
    c0 = jnp.zeros((Bp, H), jnp.float32)
    jax.lax.fori_loop(0, seq_len, step, (h0, c0), unroll=seq_len <= 16)


def lstm_pallas(x_tbe, w_ih, w_hh, b):
    """x_tbe: (T, Bp, Ep) bf16.  Returns hidden states (T, Bp, Hp) bf16."""
    T, Bp, Ep = x_tbe.shape
    H4 = w_ih.shape[1]
    Hp = H4 // 4
    out_dtype = x_tbe.dtype

    block_bytes = (x_tbe.size * x_tbe.dtype.itemsize
                   + w_ih.size * w_ih.dtype.itemsize
                   + w_hh.size * w_hh.dtype.itemsize
                   + b.size * b.dtype.itemsize
                   + T * Bp * Hp * out_dtype.itemsize)

    kernel = functools.partial(_lstm_kernel, seq_len=T, hidden=Hp)
    return pl.pallas_call(
        kernel,
        out_shape=jax.ShapeDtypeStruct((T, Bp, Hp), out_dtype),
        grid=(1,),
        in_specs=[
            pl.BlockSpec((T, Bp, Ep), lambda i: (0, 0, 0)),   # whole input sequence
            pl.BlockSpec((Ep, H4), lambda i: (0, 0)),         # W_ih (pre-transposed)
            pl.BlockSpec((Hp, H4), lambda i: (0, 0)),         # W_hh (pre-transposed)
            pl.BlockSpec((1, H4), lambda i: (0, 0)),          # b_ih + b_hh
        ],
        out_specs=pl.BlockSpec((T, Bp, Hp), lambda i: (0, 0, 0)),
        compiler_params=pltpu.CompilerParams(
            dimension_semantics=("arbitrary",),               # recurrence: sequential
            vmem_limit_bytes=_vmem_limit(block_bytes)),
    )(x_tbe, w_ih, w_hh, b)


# ------------------- kernel 2: batched FC (vocab projection) -----------------

def _fc_kernel(h_ref, w_ref, b_ref, out_ref):
    Bp, Tt, Hp = h_ref.shape
    Vt = w_ref.shape[1]
    h2 = h_ref[...].reshape(Bp * Tt, Hp)                  # leading-dim collapse (Tt%8==0)
    logits = jnp.dot(h2, w_ref[...], preferred_element_type=jnp.float32) + b_ref[...]
    out_ref[...] = logits.reshape(Bp, Tt, Vt)             # f32, lane-dense Vt


def fc_pallas(h_bth, w_fc, b_fc):
    """h_bth: (Bp, T, Hp) bf16.  Returns (Bp, Tp, Vp) f32 logits (batch-first)."""
    Bp, T0, Hp = h_bth.shape
    Vp = w_fc.shape[1]

    Tp = _round_up(T0, 8)
    t_tile = next(t for t in (128, 64, 32, 16, 8) if Tp % t == 0)
    v_tile = next(v for v in (512, 256, 128) if Vp % v == 0)
    h = _pad_to(h_bth, (Bp, Tp, Hp))

    block_bytes = (Bp * t_tile * Hp * h.dtype.itemsize
                   + Hp * v_tile * w_fc.dtype.itemsize
                   + v_tile * 4
                   + Bp * t_tile * v_tile * 4)

    return pl.pallas_call(
        _fc_kernel,
        out_shape=jax.ShapeDtypeStruct((Bp, Tp, Vp), jnp.float32),
        grid=(Tp // t_tile, Vp // v_tile),
        in_specs=[
            pl.BlockSpec((Bp, t_tile, Hp), lambda ti, vi: (0, ti, 0)),
            pl.BlockSpec((Hp, v_tile), lambda ti, vi: (0, vi)),
            pl.BlockSpec((1, v_tile), lambda ti, vi: (0, vi)),
        ],
        out_specs=pl.BlockSpec((Bp, t_tile, v_tile), lambda ti, vi: (0, ti, vi)),
        compiler_params=pltpu.CompilerParams(
            dimension_semantics=("parallel", "parallel"),     # both TCs on v7x
            vmem_limit_bytes=_vmem_limit(block_bytes)),
    )(h, w_fc, b_fc)


# --------------------------- parameters & wrapper ----------------------------

def init_params(key, embed_size, hidden_size, vocab_size):
    ks = jax.random.split(key, 7)

    def xavier(k, shape):
        fan_in, fan_out = shape[1], shape[0]
        limit = jnp.sqrt(6.0 / (fan_in + fan_out))
        return jax.random.uniform(k, shape, jnp.float32, -limit, limit)

    bound = 1.0 / jnp.sqrt(hidden_size)

    def uni(k, shape):
        return jax.random.uniform(k, shape, jnp.float32, -bound, bound)

    return {
        "emb": xavier(ks[0], (vocab_size, embed_size)),        # nn.Embedding weight
        "w_ih": uni(ks[1], (4 * hidden_size, embed_size)),     # weight_ih_l0
        "w_hh": uni(ks[2], (4 * hidden_size, hidden_size)),    # weight_hh_l0
        "b_ih": uni(ks[3], (4 * hidden_size,)),
        "b_hh": uni(ks[4], (4 * hidden_size,)),
        "w_fc": xavier(ks[5], (vocab_size, hidden_size)),      # nn.Linear weight
        "b_fc": uni(ks[6], (vocab_size,)),
    }


def prepare_decoder_params(params, compute_dtype=jnp.bfloat16):
    """One-time: transpose, combine biases, pad per-gate to 128-aligned, cast bf16."""
    E = params["w_ih"].shape[1]
    H = params["w_hh"].shape[1]
    V = params["w_fc"].shape[0]
    Ep, Hp, Vp = _round_up(E, 128), _round_up(H, 128), _round_up(V, 128)

    def gate_weight(w, inp, inp_p):            # w: (4H, inp) torch layout, gates i,f,g,o
        w4 = w.reshape(4, H, inp)
        w4 = jnp.pad(w4, ((0, 0), (0, Hp - H), (0, inp_p - inp)))
        return jnp.transpose(w4, (2, 0, 1)).reshape(inp_p, 4 * Hp).astype(compute_dtype)

    b = (params["b_ih"] + params["b_hh"]).reshape(4, H)
    b = jnp.pad(b, ((0, 0), (0, Hp - H))).reshape(1, 4 * Hp).astype(jnp.float32)

    w_fc = jnp.pad(params["w_fc"].T, ((0, Hp - H), (0, Vp - V))).astype(compute_dtype)
    b_fc = jnp.pad(params["b_fc"], (0, Vp - V)).reshape(1, Vp).astype(jnp.float32)

    return {
        "emb": params["emb"],
        "w_ih": gate_weight(params["w_ih"], E, Ep),
        "w_hh": gate_weight(params["w_hh"], H, Hp),
        "b": b,
        "w_fc": w_fc,
        "b_fc": b_fc,
        "dims": (E, H, V, Ep, Hp, Vp),
        "compute_dtype": compute_dtype,
    }


def decoder_forward(prep, features, captions):
    """features: (B, E) f32, captions: (B, Tcap) int32. Returns (B, Tcap, V) f32."""
    E, H, V, Ep, Hp, Vp = prep["dims"]
    B = features.shape[0]

    # TODO(synk): embedding gather stays in plain JAX (jnp.take); a Pallas DMA
    # gather kernel is not worthwhile at these sizes.
    cap = captions[:, :-1]
    emb = jnp.take(prep["emb"], cap, axis=0)                   # (B, Tcap-1, E)
    x = jnp.concatenate([features[:, None, :], emb], axis=1)   # (B, T, E)
    T = x.shape[1]
    Bp = _round_up(B, 8)

    x = jnp.transpose(x, (1, 0, 2))                            # (T, B, E)  (small tensor)
    x = _pad_to(x, (T, Bp, Ep)).astype(prep["compute_dtype"])

    h_tbh = lstm_pallas(x, prep["w_ih"], prep["w_hh"], prep["b"])   # (T, Bp, Hp) bf16
    # transpose the SMALL hidden tensor; the big (B,T,V) logits are emitted by
    # the FC kernel directly in their final batch-first layout.
    h_bth = jnp.transpose(h_tbh, (1, 0, 2))                    # (Bp, T, Hp)

    logits = fc_pallas(h_bth, prep["w_fc"], prep["b_fc"])      # (Bp, Tp, Vp) f32
    return logits[:B, :T, :V]


# ----------------------------- pure-JAX reference ----------------------------

def decoder_forward_ref(params, features, captions):
    cap = captions[:, :-1]
    emb = jnp.take(params["emb"], cap, axis=0)
    x = jnp.concatenate([features[:, None, :], emb], axis=1)   # (B, T, E)
    B = x.shape[0]
    H = params["w_hh"].shape[1]
    w_ih, w_hh = params["w_ih"], params["w_hh"]
    b = params["b_ih"] + params["b_hh"]

    def step(carry, x_t):
        h, c = carry
        gates = x_t @ w_ih.T + h @ w_hh.T + b
        i = jax.nn.sigmoid(gates[:, :H])
        f = jax.nn.sigmoid(gates[:, H:2 * H])
        g = jnp.tanh(gates[:, 2 * H:3 * H])
        o = jax.nn.sigmoid(gates[:, 3 * H:])
        c = f * c + i * g
        h = o * jnp.tanh(c)
        return (h, c), h

    h0 = jnp.zeros((B, H), jnp.float32)
    c0 = jnp.zeros((B, H), jnp.float32)
    _, hs = jax.lax.scan(step, (h0, c0), jnp.transpose(x, (1, 0, 2)))
    hs = jnp.transpose(hs, (1, 0, 2))                          # (B, T, H)
    return hs @ params["w_fc"].T + params["b_fc"]


# ------------------------------------ main -----------------------------------

if __name__ == "__main__":
    B, Tcap = 2, 8
    embed_size, hidden_size, vocab_size = 32, 32, 48

    key = jax.random.PRNGKey(0)
    k_params, k_feat, k_cap = jax.random.split(key, 3)

    params = init_params(k_params, embed_size, hidden_size, vocab_size)
    features = jax.random.normal(k_feat, (B, embed_size), jnp.float32)
    captions = jax.random.randint(k_cap, (B, Tcap), 0, vocab_size, jnp.int32)

    prep = prepare_decoder_params(params)
    out = decoder_forward(prep, features, captions)
    out = jax.block_until_ready(out)

    # captions[:, :-1] -> Tcap-1 embedded steps, +1 feature step => Tcap timesteps
    assert out.shape == (B, Tcap, vocab_size), out.shape
    assert out.dtype == jnp.float32

    ref = decoder_forward_ref(params, features, captions)
    max_err = float(jnp.max(jnp.abs(out - ref)))
    assert jnp.allclose(out, ref, atol=5e-2, rtol=5e-2), f"max abs err {max_err}"

    print("KERNEL_OK")
</pallas_src>

<mosaic_0001>
module attributes {stable_mosaic.version = 11 : i64} {
  func.func @_lstm_kernel(%arg0: i32, %arg1: memref<8x8x128xbf16, #tpu.memory_space<vmem>>, %arg2: memref<128x512xbf16, #tpu.memory_space<vmem>>, %arg3: memref<128x512xbf16, #tpu.memory_space<vmem>>, %arg4: memref<1x512xf32, #tpu.memory_space<vmem>>, %arg5: memref<8x8x128xbf16, #tpu.memory_space<vmem>>) attributes {dimension_semantics = [#tpu.dimension_semantics<arbitrary>], iteration_bounds = array<i64: 1>, scalar_prefetch = 0 : i64, scratch_operands = 0 : i64, tpu.core_type = #tpu.core_type<tc>, window_params = [{pipeline_mode = #tpu.pipeline_mode<synchronous>, transform_indices = @transform_0, window_bounds = array<i64: 8, 8, 128>}, {pipeline_mode = #tpu.pipeline_mode<synchronous>, transform_indices = @transform_1, window_bounds = array<i64: 128, 512>}, {pipeline_mode = #tpu.pipeline_mode<synchronous>, transform_indices = @transform_2, window_bounds = array<i64: 128, 512>}, {pipeline_mode = #tpu.pipeline_mode<synchronous>, transform_indices = @transform_3, window_bounds = array<i64: 1, 512>}, {pipeline_mode = #tpu.pipeline_mode<synchronous>, transform_indices = @transform_4, window_bounds = array<i64: 8, 8, 128>}]} {
    %c0 = arith.constant 0 : index
    %c0_0 = arith.constant 0 : index
    %0 = vector.load %arg2[%c0, %c0_0] : memref<128x512xbf16, #tpu.memory_space<vmem>>, vector<128x512xbf16>
    %c0_1 = arith.constant 0 : index
    %c0_2 = arith.constant 0 : index
    %1 = vector.load %arg3[%c0_1, %c0_2] : memref<128x512xbf16, #tpu.memory_space<vmem>>, vector<128x512xbf16>
    %c0_3 = arith.constant 0 : index
    %c0_4 = arith.constant 0 : index
    %2 = vector.load %arg4[%c0_3, %c0_4] : memref<1x512xf32, #tpu.memory_space<vmem>>, vector<1x512xf32>
    %3 = vector.shape_cast %2 : vector<1x512xf32> to vector<1x512xf32>
    %4 = vector.broadcast %3 : vector<1x512xf32> to vector<8x512xf32>
    %cst = arith.constant 0.000000e+00 : f32
    %5 = vector.broadcast %cst : f32 to vector<8x128xf32>
    %cst_5 = arith.constant 0.000000e+00 : f32
    %6 = vector.broadcast %cst_5 : f32 to vector<8x128xf32>
    %c0_i32 = arith.constant 0 : i32
    %7 = arith.index_cast %c0_i32 : i32 to index
    %c0_6 = arith.constant 0 : index
    %c0_7 = arith.constant 0 : index
    %8 = vector.load %arg1[%7, %c0_6, %c0_7] : memref<8x8x128xbf16, #tpu.memory_space<vmem>>, vector<1x8x128xbf16>
    %9 = vector.shape_cast %8 : vector<1x8x128xbf16> to vector<8x128xbf16>
    %cst_8 = arith.constant dense<0.000000e+00> : vector<8x512xf32>
    %10 = tpu.matmul %9, %0, %cst_8 {dimension_numbers = #tpu.dot_dimension_numbers<[1], [0], [0], [1], [0, 0, 1, 1], [], []>} : vector<8x128xbf16>, vector<128x512xbf16>, vector<8x512xf32> -> vector<8x512xf32>
    %11 = arith.truncf %5 : vector<8x128xf32> to vector<8x128xbf16>
    %cst_9 = arith.constant dense<0.000000e+00> : vector<8x512xf32>
    %12 = tpu.matmul %11, %1, %cst_9 {dimension_numbers = #tpu.dot_dimension_numbers<[1], [0], [0], [1], [0, 0, 1, 1], [], []>} : vector<8x128xbf16>, vector<128x512xbf16>, vector<8x512xf32> -> vector<8x512xf32>
    %13 = arith.addf %10, %12 : vector<8x512xf32>
    %14 = arith.addf %13, %4 : vector<8x512xf32>
    %15 = vector.extract_strided_slice %14 {offsets = [0, 0], sizes = [8, 128], strides = [1, 1]} : vector<8x512xf32> to vector<8x128xf32>
    %16 = arith.negf %15 : vector<8x128xf32>
    %17 = math.exp %16 : vector<8x128xf32>
    %cst_10 = arith.constant 1.000000e+00 : f32
    %18 = vector.broadcast %cst_10 : f32 to vector<8x128xf32>
    %19 = arith.addf %18, %17 : vector<8x128xf32>
    %20 = arith.divf %18, %19 : vector<8x128xf32>
    %21 = vector.extract_strided_slice %14 {offsets = [0, 128], sizes = [8, 128], strides = [1, 1]} : vector<8x512xf32> to vector<8x128xf32>
    %22 = arith.negf %21 : vector<8x128xf32>
    %23 = math.exp %22 : vector<8x128xf32>
    %cst_11 = arith.constant 1.000000e+00 : f32
    %24 = vector.broadcast %cst_11 : f32 to vector<8x128xf32>
    %25 = arith.addf %24, %23 : vector<8x128xf32>
    %26 = arith.divf %24, %25 : vector<8x128xf32>
    %27 = vector.extract_strided_slice %14 {offsets = [0, 256], sizes = [8, 128], strides = [1, 1]} : vector<8x512xf32> to vector<8x128xf32>
    %28 = math.tanh %27 : vector<8x128xf32>
    %29 = vector.extract_strided_slice %14 {offsets = [0, 384], sizes = [8, 128], strides = [1, 1]} : vector<8x512xf32> to vector<8x128xf32>
    %30 = arith.negf %29 : vector<8x128xf32>
    %31 = math.exp %30 : vector<8x128xf32>
    %cst_12 = arith.constant 1.000000e+00 : f32
    %32 = vector.broadcast %cst_12 : f32 to vector<8x128xf32>
    %33 = arith.addf %32, %31 : vector<8x128xf32>
    %34 = arith.divf %32, %33 : vector<8x128xf32>
    %35 = arith.mulf %26, %6 : vector<8x128xf32>
    %36 = arith.mulf %20, %28 : vector<8x128xf32>
    %37 = arith.addf %35, %36 : vector<8x128xf32>
    %38 = math.tanh %37 : vector<8x128xf32>
    %39 = arith.mulf %34, %38 : vector<8x128xf32>
    %40 = arith.truncf %39 : vector<8x128xf32> to vector<8x128xbf16>
    %41 = arith.index_cast %c0_i32 : i32 to index
    %c0_13 = arith.constant 0 : index
    %c0_14 = arith.constant 0 : index
    %42 = vector.load %arg5[%41, %c0_13, %c0_14] : memref<8x8x128xbf16, #tpu.memory_space<vmem>>, vector<1x8x128xbf16>
    %43 = vector.shape_cast %42 : vector<1x8x128xbf16> to vector<8x128xbf16>
    %44 = vector.shape_cast %40 : vector<8x128xbf16> to vector<1x8x128xbf16>
    tpu.vector_store %arg5[%41, %c0_13, %c0_14], %44 {strides = array<i32>} : memref<8x8x128xbf16, #tpu.memory_space<vmem>>, vector<1x8x128xbf16>,
    %c1_i32 = arith.constant 1 : i32
    %45 = arith.index_cast %c1_i32 : i32 to index
    %c0_15 = arith.constant 0 : index
    %c0_16 = arith.constant 0 : index
    %46 = vector.load %arg1[%45, %c0_15, %c0_16] : memref<8x8x128xbf16, #tpu.memory_space<vmem>>, vector<1x8x128xbf16>
    %47 = vector.shape_cast %46 : vector<1x8x128xbf16> to vector<8x128xbf16>
    %cst_17 = arith.constant dense<0.000000e+00> : vector<8x512xf32>
    %48 = tpu.matmul %47, %0, %cst_17 {dimension_numbers = #tpu.dot_dimension_numbers<[1], [0], [0], [1], [0, 0, 1, 1], [], []>} : vector<8x128xbf16>, vector<128x512xbf16>, vector<8x512xf32> -> vector<8x512xf32>
    %49 = arith.truncf %39 : vector<8x128xf32> to vector<8x128xbf16>
    %cst_18 = arith.constant dense<0.000000e+00> : vector<8x512xf32>
    %50 = tpu.matmul %49, %1, %cst_18 {dimension_numbers = #tpu.dot_dimension_numbers<[1], [0], [0], [1], [0, 0, 1, 1], [], []>} : vector<8x128xbf16>, vector<128x512xbf16>, vector<8x512xf32> -> vector<8x512xf32>
    %51 = arith.addf %48, %50 : vector<8x512xf32>
    %52 = arith.addf %51, %4 : vector<8x512xf32>
    %53 = vector.extract_strided_slice %52 {offsets = [0, 0], sizes = [8, 128], strides = [1, 1]} : vector<8x512xf32> to vector<8x128xf32>
    %54 = arith.negf %53 : vector<8x128xf32>
    %55 = math.exp %54 : vector<8x128xf32>
    %cst_19 = arith.constant 1.000000e+00 : f32
    %56 = vector.broadcast %cst_19 : f32 to vector<8x128xf32>
    %57 = arith.addf %56, %55 : vector<8x128xf32>
    %58 = arith.divf %56, %57 : vector<8x128xf32>
    %59 = vector.extract_strided_slice %52 {offsets = [0, 128], sizes = [8, 128], strides = [1, 1]} : vector<8x512xf32> to vector<8x128xf32>
    %60 = arith.negf %59 : vector<8x128xf32>
    %61 = math.exp %60 : vector<8x128xf32>
    %cst_20 = arith.constant 1.000000e+00 : f32
    %62 = vector.broadcast %cst_20 : f32 to vector<8x128xf32>
    %63 = arith.addf %62, %61 : vector<8x128xf32>
    %64 = arith.divf %62, %63 : vector<8x128xf32>
    %65 = vector.extract_strided_slice %52 {offsets = [0, 256], sizes = [8, 128], strides = [1, 1]} : vector<8x512xf32> to vector<8x128xf32>
    %66 = math.tanh %65 : vector<8x128xf32>
    %67 = vector.extract_strided_slice %52 {offsets = [0, 384], sizes = [8, 128], strides = [1, 1]} : vector<8x512xf32> to vector<8x128xf32>
    %68 = arith.negf %67 : vector<8x128xf32>
    %69 = math.exp %68 : vector<8x128xf32>
    %cst_21 = arith.constant 1.000000e+00 : f32
    %70 = vector.broadcast %cst_21 : f32 to vector<8x128xf32>
    %71 = arith.addf %70, %69 : vector<8x128xf32>
    %72 = arith.divf %70, %71 : vector<8x128xf32>
    %73 = arith.mulf %64, %37 : vector<8x128xf32>
    %74 = arith.mulf %58, %66 : vector<8x128xf32>
    %75 = arith.addf %73, %74 : vector<8x128xf32>
    %76 = math.tanh %75 : vector<8x128xf32>
    %77 = arith.mulf %72, %76 : vector<8x128xf32>
    %78 = arith.truncf %77 : vector<8x128xf32> to vector<8x128xbf16>
    %79 = arith.index_cast %c1_i32 : i32 to index
    %c0_22 = arith.constant 0 : index
    %c0_23 = arith.constant 0 : index
    %80 = vector.load %arg5[%79, %c0_22, %c0_23] : memref<8x8x128xbf16, #tpu.memory_space<vmem>>, vector<1x8x128xbf16>
    %81 = vector.shape_cast %80 : vector<1x8x128xbf16> to vector<8x128xbf16>
    %82 = vector.shape_cast %78 : vector<8x128xbf16> to vector<1x8x128xbf16>
    tpu.vector_store %arg5[%79, %c0_22, %c0_23], %82 {strides = array<i32>} : memref<8x8x128xbf16, #tpu.memory_space<vmem>>, vector<1x8x128xbf16>,
    %c2_i32 = arith.constant 2 : i32
    %83 = arith.index_cast %c2_i32 : i32 to index
    %c0_24 = arith.constant 0 : index
    %c0_25 = arith.constant 0 : index
    %84 = vector.load %arg1[%83, %c0_24, %c0_25] : memref<8x8x128xbf16, #tpu.memory_space<vmem>>, vector<1x8x128xbf16>
    %85 = vector.shape_cast %84 : vector<1x8x128xbf16> to vector<8x128xbf16>
    %cst_26 = arith.constant dense<0.000000e+00> : vector<8x512xf32>
    %86 = tpu.matmul %85, %0, %cst_26 {dimension_numbers = #tpu.dot_dimension_numbers<[1], [0], [0], [1], [0, 0, 1, 1], [], []>} : vector<8x128xbf16>, vector<128x512xbf16>, vector<8x512xf32> -> vector<8x512xf32>
    %87 = arith.truncf %77 : vector<8x128xf32> to vector<8x128xbf16>
    %cst_27 = arith.constant dense<0.000000e+00> : vector<8x512xf32>
    %88 = tpu.matmul %87, %1, %cst_27 {dimension_numbers = #tpu.dot_dimension_numbers<[1], [0], [0], [1], [0, 0, 1, 1], [], []>} : vector<8x128xbf16>, vector<128x512xbf16>, vector<8x512xf32> -> vector<8x512xf32>
    %89 = arith.addf %86, %88 : vector<8x512xf32>
    %90 = arith.addf %89, %4 : vector<8x512xf32>
    %91 = vector.extract_strided_slice %90 {offsets = [0, 0], sizes = [8, 128], strides = [1, 1]} : vector<8x512xf32> to vector<8x128xf32>
    %92 = arith.negf %91 : vector<8x128xf32>
    %93 = math.exp %92 : vector<8x128xf32>
    %cst_28 = arith.constant 1.000000e+00 : f32
    %94 = vector.broadcast %cst_28 : f32 to vector<8x128xf32>
    %95 = arith.addf %94, %93 : vector<8x128xf32>
    %96 = arith.divf %94, %95 : vector<8x128xf32>
    %97 = vector.extract_strided_slice %90 {offsets = [0, 128], sizes = [8, 128], strides = [1, 1]} : vector<8x512xf32> to vector<8x128xf32>
    %98 = arith.negf %97 : vector<8x128xf32>
    %99 = math.exp %98 : vector<8x128xf32>
    %cst_29 = arith.constant 1.000000e+00 : f32
    %100 = vector.broadcast %cst_29 : f32 to vector<8x128xf32>
    %101 = arith.addf %100, %99 : vector<8x128xf32>
    %102 = arith.divf %100, %101 : vector<8x128xf32>
    %103 = vector.extract_strided_slice %90 {offsets = [0, 256], sizes = [8, 128], strides = [1, 1]} : vector<8x512xf32> to vector<8x128xf32>
    %104 = math.tanh %103 : vector<8x128xf32>
    %105 = vector.extract_strided_slice %90 {offsets = [0, 384], sizes = [8, 128], strides = [1, 1]} : vector<8x512xf32> to vector<8x128xf32>
    %106 = arith.negf %105 : vector<8x128xf32>
    %107 = math.exp %106 : vector<8x128xf32>
    %cst_30 = arith.constant 1.000000e+00 : f32
    %108 = vector.broadcast %cst_30 : f32 to vector<8x128xf32>
    %109 = arith.addf %108, %107 : vector<8x128xf32>
    %110 = arith.divf %108, %109 : vector<8x128xf32>
    %111 = arith.mulf %102, %75 : vector<8x128xf32>
    %112 = arith.mulf %96, %104 : vector<8x128xf32>
    %113 = arith.addf %111, %112 : vector<8x128xf32>
    %114 = math.tanh %113 : vector<8x128xf32>
    %115 = arith.mulf %110, %114 : vector<8x128xf32>
    %116 = arith.truncf %115 : vector<8x128xf32> to vector<8x128xbf16>
    %117 = arith.index_cast %c2_i32 : i32 to index
    %c0_31 = arith.constant 0 : index
    %c0_32 = arith.constant 0 : index
    %118 = vector.load %arg5[%117, %c0_31, %c0_32] : memref<8x8x128xbf16, #tpu.memory_space<vmem>>, vector<1x8x128xbf16>
    %119 = vector.shape_cast %118 : vector<1x8x128xbf16> to vector<8x128xbf16>
    %120 = vector.shape_cast %116 : vector<8x128xbf16> to vector<1x8x128xbf16>
    tpu.vector_store %arg5[%117, %c0_31, %c0_32], %120 {strides = array<i32>} : memref<8x8x128xbf16, #tpu.memory_space<vmem>>, vector<1x8x128xbf16>,
    %c3_i32 = arith.constant 3 : i32
    %121 = arith.index_cast %c3_i32 : i32 to index
    %c0_33 = arith.constant 0 : index
    %c0_34 = arith.constant 0 : index
    %122 = vector.load %arg1[%121, %c0_33, %c0_34] : memref<8x8x128xbf16, #tpu.memory_space<vmem>>, vector<1x8x128xbf16>
    %123 = vector.shape_cast %122 : vector<1x8x128xbf16> to vector<8x128xbf16>
    %cst_35 = arith.constant dense<0.000000e+00> : vector<8x512xf32>
    %124 = tpu.matmul %123, %0, %cst_35 {dimension_numbers = #tpu.dot_dimension_numbers<[1], [0], [0], [1], [0, 0, 1, 1], [], []>} : vector<8x128xbf16>, vector<128x512xbf16>, vector<8x512xf32> -> vector<8x512xf32>
    %125 = arith.truncf %115 : vector<8x128xf32> to vector<8x128xbf16>
    %cst_36 = arith.constant dense<0.000000e+00> : vector<8x512xf32>
    %126 = tpu.matmul %125, %1, %cst_36 {dimension_numbers = #tpu.dot_dimension_numbers<[1], [0], [0], [1], [0, 0, 1, 1], [], []>} : vector<8x128xbf16>, vector<128x512xbf16>, vector<8x512xf32> -> vector<8x512xf32>
    %127 = arith.addf %124, %126 : vector<8x512xf32>
    %128 = arith.addf %127, %4 : vector<8x512xf32>
    %129 = vector.extract_strided_slice %128 {offsets = [0, 0], sizes = [8, 128], strides = [1, 1]} : vector<8x512xf32> to vector<8x128xf32>
    %130 = arith.negf %129 : vector<8x128xf32>
    %131 = math.exp %130 : vector<8x128xf32>
    %cst_37 = arith.constant 1.000000e+00 : f32
    %132 = vector.broadcast %cst_37 : f32 to vector<8x128xf32>
    %133 = arith.addf %132, %131 : vector<8x128xf32>
    %134 = arith.divf %132, %133 : vector<8x128xf32>
    %135 = vector.extract_strided_slice %128 {offsets = [0, 128], sizes = [8, 128], strides = [1, 1]} : vector<8x512xf32> to vector<8x128xf32>
    %136 = arith.negf %135 : vector<8x128xf32>
    %137 = math.exp %136 : vector<8x128xf32>
    %cst_38 = arith.constant 1.000000e+00 : f32
    %138 = vector.broadcast %cst_38 : f32 to vector<8x128xf32>
    %139 = arith.addf %138, %137 : vector<8x128xf32>
    %140 = arith.divf %138, %139 : vector<8x128xf32>
    %141 = vector.extract_strided_slice %128 {offsets = [0, 256], sizes = [8, 128], strides = [1, 1]} : vector<8x512xf32> to vector<8x128xf32>
    %142 = math.tanh %141 : vector<8x128xf32>
    %143 = vector.extract_strided_slice %128 {offsets = [0, 384], sizes = [8, 128], strides = [1, 1]} : vector<8x512xf32> to vector<8x128xf32>
    %144 = arith.negf %143 : vector<8x128xf32>
    %145 = math.exp %144 : vector<8x128xf32>
    %cst_39 = arith.constant 1.000000e+00 : f32
    %146 = vector.broadcast %cst_39 : f32 to vector<8x128xf32>
    %147 = arith.addf %146, %145 : vector<8x128xf32>
    %148 = arith.divf %146, %147 : vector<8x128xf32>
    %149 = arith.mulf %140, %113 : vector<8x128xf32>
    %150 = arith.mulf %134, %142 : vector<8x128xf32>
    %151 = arith.addf %149, %150 : vector<8x128xf32>
    %152 = math.tanh %151 : vector<8x128xf32>
    %153 = arith.mulf %148, %152 : vector<8x128xf32>
    %154 = arith.truncf %153 : vector<8x128xf32> to vector<8x128xbf16>
    %155 = arith.index_cast %c3_i32 : i32 to index
    %c0_40 = arith.constant 0 : index
    %c0_41 = arith.constant 0 : index
    %156 = vector.load %arg5[%155, %c0_40, %c0_41] : memref<8x8x128xbf16, #tpu.memory_space<vmem>>, vector<1x8x128xbf16>
    %157 = vector.shape_cast %156 : vector<1x8x128xbf16> to vector<8x128xbf16>
    %158 = vector.shape_cast %154 : vector<8x128xbf16> to vector<1x8x128xbf16>
    tpu.vector_store %arg5[%155, %c0_40, %c0_41], %158 {strides = array<i32>} : memref<8x8x128xbf16, #tpu.memory_space<vmem>>, vector<1x8x128xbf16>,
    %c4_i32 = arith.constant 4 : i32
    %159 = arith.index_cast %c4_i32 : i32 to index
    %c0_42 = arith.constant 0 : index
    %c0_43 = arith.constant 0 : index
    %160 = vector.load %arg1[%159, %c0_42, %c0_43] : memref<8x8x128xbf16, #tpu.memory_space<vmem>>, vector<1x8x128xbf16>
    %161 = vector.shape_cast %160 : vector<1x8x128xbf16> to vector<8x128xbf16>
    %cst_44 = arith.constant dense<0.000000e+00> : vector<8x512xf32>
    %162 = tpu.matmul %161, %0, %cst_44 {dimension_numbers = #tpu.dot_dimension_numbers<[1], [0], [0], [1], [0, 0, 1, 1], [], []>} : vector<8x128xbf16>, vector<128x512xbf16>, vector<8x512xf32> -> vector<8x512xf32>
    %163 = arith.truncf %153 : vector<8x128xf32> to vector<8x128xbf16>
    %cst_45 = arith.constant dense<0.000000e+00> : vector<8x512xf32>
    %164 = tpu.matmul %163, %1, %cst_45 {dimension_numbers = #tpu.dot_dimension_numbers<[1], [0], [0], [1], [0, 0, 1, 1], [], []>} : vector<8x128xbf16>, vector<128x512xbf16>, vector<8x512xf32> -> vector<8x512xf32>
    %165 = arith.addf %162, %164 : vector<8x512xf32>
    %166 = arith.addf %165, %4 : vector<8x512xf32>
    %167 = vector.extract_strided_slice %166 {offsets = [0, 0], sizes = [8, 128], strides = [1, 1]} : vector<8x512xf32> to vector<8x128xf32>
    %168 = arith.negf %167 : vector<8x128xf32>
    %169 = math.exp %168 : vector<8x128xf32>
    %cst_46 = arith.constant 1.000000e+00 : f32
    %170 = vector.broadcast %cst_46 : f32 to vector<8x128xf32>
    %171 = arith.addf %170, %169 : vector<8x128xf32>
    %172 = arith.divf %170, %171 : vector<8x128xf32>
    %173 = vector.extract_strided_slice %166 {offsets = [0, 128], sizes = [8, 128], strides = [1, 1]} : vector<8x512xf32> to vector<8x128xf32>
    %174 = arith.negf %173 : vector<8x128xf32>
    %175 = math.exp %174 : vector<8x128xf32>
    %cst_47 = arith.constant 1.000000e+00 : f32
    %176 = vector.broadcast %cst_47 : f32 to vector<8x128xf32>
    %177 = arith.addf %176, %175 : vector<8x128xf32>
    %178 = arith.divf %176, %177 : vector<8x128xf32>
    %179 = vector.extract_strided_slice %166 {offsets = [0, 256], sizes = [8, 128], strides = [1, 1]} : vector<8x512xf32> to vector<8x128xf32>
    %180 = math.tanh %179 : vector<8x128xf32>
    %181 = vector.extract_strided_slice %166 {offsets = [0, 384], sizes = [8, 128], strides = [1, 1]} : vector<8x512xf32> to vector<8x128xf32>
    %182 = arith.negf %181 : vector<8x128xf32>
    %183 = math.exp %182 : vector<8x128xf32>
    %cst_48 = arith.constant 1.000000e+00 : f32
    %184 = vector.broadcast %cst_48 : f32 to vector<8x128xf32>
    %185 = arith.addf %184, %183 : vector<8x128xf32>
    %186 = arith.divf %184, %185 : vector<8x128xf32>
    %187 = arith.mulf %178, %151 : vector<8x128xf32>
    %188 = arith.mulf %172, %180 : vector<8x128xf32>
    %189 = arith.addf %187, %188 : vector<8x128xf32>
    %190 = math.tanh %189 : vector<8x128xf32>
    %191 = arith.mulf %186, %190 : vector<8x128xf32>
    %192 = arith.truncf %191 : vector<8x128xf32> to vector<8x128xbf16>
    %193 = arith.index_cast %c4_i32 : i32 to index
    %c0_49 = arith.constant 0 : index
    %c0_50 = arith.constant 0 : index
    %194 = vector.load %arg5[%193, %c0_49, %c0_50] : memref<8x8x128xbf16, #tpu.memory_space<vmem>>, vector<1x8x128xbf16>
    %195 = vector.shape_cast %194 : vector<1x8x128xbf16> to vector<8x128xbf16>
    %196 = vector.shape_cast %192 : vector<8x128xbf16> to vector<1x8x128xbf16>
    tpu.vector_store %arg5[%193, %c0_49, %c0_50], %196 {strides = array<i32>} : memref<8x8x128xbf16, #tpu.memory_space<vmem>>, vector<1x8x128xbf16>,
    %c5_i32 = arith.constant 5 : i32
    %197 = arith.index_cast %c5_i32 : i32 to index
    %c0_51 = arith.constant 0 : index
    %c0_52 = arith.constant 0 : index
    %198 = vector.load %arg1[%197, %c0_51, %c0_52] : memref<8x8x128xbf16, #tpu.memory_space<vmem>>, vector<1x8x128xbf16>
    %199 = vector.shape_cast %198 : vector<1x8x128xbf16> to vector<8x128xbf16>
    %cst_53 = arith.constant dense<0.000000e+00> : vector<8x512xf32>
    %200 = tpu.matmul %199, %0, %cst_53 {dimension_numbers = #tpu.dot_dimension_numbers<[1], [0], [0], [1], [0, 0, 1, 1], [], []>} : vector<8x128xbf16>, vector<128x512xbf16>, vector<8x512xf32> -> vector<8x512xf32>
    %201 = arith.truncf %191 : vector<8x128xf32> to vector<8x128xbf16>
    %cst_54 = arith.constant dense<0.000000e+00> : vector<8x512xf32>
    %202 = tpu.matmul %201, %1, %cst_54 {dimension_numbers = #tpu.dot_dimension_numbers<[1], [0], [0], [1], [0, 0, 1, 1], [], []>} : vector<8x128xbf16>, vector<128x512xbf16>, vector<8x512xf32> -> vector<8x512xf32>
    %203 = arith.addf %200, %202 : vector<8x512xf32>
    %204 = arith.addf %203, %4 : vector<8x512xf32>
    %205 = vector.extract_strided_slice %204 {offsets = [0, 0], sizes = [8, 128], strides = [1, 1]} : vector<8x512xf32> to vector<8x128xf32>
    %206 = arith.negf %205 : vector<8x128xf32>
    %207 = math.exp %206 : vector<8x128xf32>
    %cst_55 = arith.constant 1.000000e+00 : f32
    %208 = vector.broadcast %cst_55 : f32 to vector<8x128xf32>
    %209 = arith.addf %208, %207 : vector<8x128xf32>
    %210 = arith.divf %208, %209 : vector<8x128xf32>
    %211 = vector.extract_strided_slice %204 {offsets = [0, 128], sizes = [8, 128], strides = [1, 1]} : vector<8x512xf32> to vector<8x128xf32>
    %212 = arith.negf %211 : vector<8x128xf32>
    %213 = math.exp %212 : vector<8x128xf32>
    %cst_56 = arith.constant 1.000000e+00 : f32
    %214 = vector.broadcast %cst_56 : f32 to vector<8x128xf32>
    %215 = arith.addf %214, %213 : vector<8x128xf32>
    %216 = arith.divf %214, %215 : vector<8x128xf32>
    %217 = vector.extract_strided_slice %204 {offsets = [0, 256], sizes = [8, 128], strides = [1, 1]} : vector<8x512xf32> to vector<8x128xf32>
    %218 = math.tanh %217 : vector<8x128xf32>
    %219 = vector.extract_strided_slice %204 {offsets = [0, 384], sizes = [8, 128], strides = [1, 1]} : vector<8x512xf32> to vector<8x128xf32>
    %220 = arith.negf %219 : vector<8x128xf32>
    %221 = math.exp %220 : vector<8x128xf32>
    %cst_57 = arith.constant 1.000000e+00 : f32
    %222 = vector.broadcast %cst_57 : f32 to vector<8x128xf32>
    %223 = arith.addf %222, %221 : vector<8x128xf32>
    %224 = arith.divf %222, %223 : vector<8x128xf32>
    %225 = arith.mulf %216, %189 : vector<8x128xf32>
    %226 = arith.mulf %210, %218 : vector<8x128xf32>
    %227 = arith.addf %225, %226 : vector<8x128xf32>
    %228 = math.tanh %227 : vector<8x128xf32>
    %229 = arith.mulf %224, %228 : vector<8x128xf32>
    %230 = arith.truncf %229 : vector<8x128xf32> to vector<8x128xbf16>
    %231 = arith.index_cast %c5_i32 : i32 to index
    %c0_58 = arith.constant 0 : index
    %c0_59 = arith.constant 0 : index
    %232 = vector.load %arg5[%231, %c0_58, %c0_59] : memref<8x8x128xbf16, #tpu.memory_space<vmem>>, vector<1x8x128xbf16>
    %233 = vector.shape_cast %232 : vector<1x8x128xbf16> to vector<8x128xbf16>
    %234 = vector.shape_cast %230 : vector<8x128xbf16> to vector<1x8x128xbf16>
    tpu.vector_store %arg5[%231, %c0_58, %c0_59], %234 {strides = array<i32>} : memref<8x8x128xbf16, #tpu.memory_space<vmem>>, vector<1x8x128xbf16>,
    %c6_i32 = arith.constant 6 : i32
    %235 = arith.index_cast %c6_i32 : i32 to index
    %c0_60 = arith.constant 0 : index
    %c0_61 = arith.constant 0 : index
    %236 = vector.load %arg1[%235, %c0_60, %c0_61] : memref<8x8x128xbf16, #tpu.memory_space<vmem>>, vector<1x8x128xbf16>
    %237 = vector.shape_cast %236 : vector<1x8x128xbf16> to vector<8x128xbf16>
    %cst_62 = arith.constant dense<0.000000e+00> : vector<8x512xf32>
    %238 = tpu.matmul %237, %0, %cst_62 {dimension_numbers = #tpu.dot_dimension_numbers<[1], [0], [0], [1], [0, 0, 1, 1], [], []>} : vector<8x128xbf16>, vector<128x512xbf16>, vector<8x512xf32> -> vector<8x512xf32>
    %239 = arith.truncf %229 : vector<8x128xf32> to vector<8x128xbf16>
    %cst_63 = arith.constant dense<0.000000e+00> : vector<8x512xf32>
    %240 = tpu.matmul %239, %1, %cst_63 {dimension_numbers = #tpu.dot_dimension_numbers<[1], [0], [0], [1], [0, 0, 1, 1], [], []>} : vector<8x128xbf16>, vector<128x512xbf16>, vector<8x512xf32> -> vector<8x512xf32>
    %241 = arith.addf %238, %240 : vector<8x512xf32>
    %242 = arith.addf %241, %4 : vector<8x512xf32>
    %243 = vector.extract_strided_slice %242 {offsets = [0, 0], sizes = [8, 128], strides = [1, 1]} : vector<8x512xf32> to vector<8x128xf32>
    %244 = arith.negf %243 : vector<8x128xf32>
    %245 = math.exp %244 : vector<8x128xf32>
    %cst_64 = arith.constant 1.000000e+00 : f32
    %246 = vector.broadcast %cst_64 : f32 to vector<8x128xf32>
    %247 = arith.addf %246, %245 : vector<8x128xf32>
    %248 = arith.divf %246, %247 : vector<8x128xf32>
    %249 = vector.extract_strided_slice %242 {offsets = [0, 128], sizes = [8, 128], strides = [1, 1]} : vector<8x512xf32> to vector<8x128xf32>
    %250 = arith.negf %249 : vector<8x128xf32>
    %251 = math.exp %250 : vector<8x128xf32>
    %cst_65 = arith.constant 1.000000e+00 : f32
    %252 = vector.broadcast %cst_65 : f32 to vector<8x128xf32>
    %253 = arith.addf %252, %251 : vector<8x128xf32>
    %254 = arith.divf %252, %253 : vector<8x128xf32>
    %255 = vector.extract_strided_slice %242 {offsets = [0, 256], sizes = [8, 128], strides = [1, 1]} : vector<8x512xf32> to vector<8x128xf32>
    %256 = math.tanh %255 : vector<8x128xf32>
    %257 = vector.extract_strided_slice %242 {offsets = [0, 384], sizes = [8, 128], strides = [1, 1]} : vector<8x512xf32> to vector<8x128xf32>
    %258 = arith.negf %257 : vector<8x128xf32>
    %259 = math.exp %258 : vector<8x128xf32>
    %cst_66 = arith.constant 1.000000e+00 : f32
    %260 = vector.broadcast %cst_66 : f32 to vector<8x128xf32>
    %261 = arith.addf %260, %259 : vector<8x128xf32>
    %262 = arith.divf %260, %261 : vector<8x128xf32>
    %263 = arith.mulf %254, %227 : vector<8x128xf32>
    %264 = arith.mulf %248, %256 : vector<8x128xf32>
    %265 = arith.addf %263, %264 : vector<8x128xf32>
    %266 = math.tanh %265 : vector<8x128xf32>
    %267 = arith.mulf %262, %266 : vector<8x128xf32>
    %268 = arith.truncf %267 : vector<8x128xf32> to vector<8x128xbf16>
    %269 = arith.index_cast %c6_i32 : i32 to index
    %c0_67 = arith.constant 0 : index
    %c0_68 = arith.constant 0 : index
    %270 = vector.load %arg5[%269, %c0_67, %c0_68] : memref<8x8x128xbf16, #tpu.memory_space<vmem>>, vector<1x8x128xbf16>
    %271 = vector.shape_cast %270 : vector<1x8x128xbf16> to vector<8x128xbf16>
    %272 = vector.shape_cast %268 : vector<8x128xbf16> to vector<1x8x128xbf16>
    tpu.vector_store %arg5[%269, %c0_67, %c0_68], %272 {strides = array<i32>} : memref<8x8x128xbf16, #tpu.memory_space<vmem>>, vector<1x8x128xbf16>,
    %c7_i32 = arith.constant 7 : i32
    %273 = arith.index_cast %c7_i32 : i32 to index
    %c0_69 = arith.constant 0 : index
    %c0_70 = arith.constant 0 : index
    %274 = vector.load %arg1[%273, %c0_69, %c0_70] : memref<8x8x128xbf16, #tpu.memory_space<vmem>>, vector<1x8x128xbf16>
    %275 = vector.shape_cast %274 : vector<1x8x128xbf16> to vector<8x128xbf16>
    %cst_71 = arith.constant dense<0.000000e+00> : vector<8x512xf32>
    %276 = tpu.matmul %275, %0, %cst_71 {dimension_numbers = #tpu.dot_dimension_numbers<[1], [0], [0], [1], [0, 0, 1, 1], [], []>} : vector<8x128xbf16>, vector<128x512xbf16>, vector<8x512xf32> -> vector<8x512xf32>
    %277 = arith.truncf %267 : vector<8x128xf32> to vector<8x128xbf16>
    %cst_72 = arith.constant dense<0.000000e+00> : vector<8x512xf32>
    %278 = tpu.matmul %277, %1, %cst_72 {dimension_numbers = #tpu.dot_dimension_numbers<[1], [0], [0], [1], [0, 0, 1, 1], [], []>} : vector<8x128xbf16>, vector<128x512xbf16>, vector<8x512xf32> -> vector<8x512xf32>
    %279 = arith.addf %276, %278 : vector<8x512xf32>
    %280 = arith.addf %279, %4 : vector<8x512xf32>
    %281 = vector.extract_strided_slice %280 {offsets = [0, 0], sizes = [8, 128], strides = [1, 1]} : vector<8x512xf32> to vector<8x128xf32>
    %282 = arith.negf %281 : vector<8x128xf32>
    %283 = math.exp %282 : vector<8x128xf32>
    %cst_73 = arith.constant 1.000000e+00 : f32
    %284 = vector.broadcast %cst_73 : f32 to vector<8x128xf32>
    %285 = arith.addf %284, %283 : vector<8x128xf32>
    %286 = arith.divf %284, %285 : vector<8x128xf32>
    %287 = vector.extract_strided_slice %280 {offsets = [0, 128], sizes = [8, 128], strides = [1, 1]} : vector<8x512xf32> to vector<8x128xf32>
    %288 = arith.negf %287 : vector<8x128xf32>
    %289 = math.exp %288 : vector<8x128xf32>
    %cst_74 = arith.constant 1.000000e+00 : f32
    %290 = vector.broadcast %cst_74 : f32 to vector<8x128xf32>
    %291 = arith.addf %290, %289 : vector<8x128xf32>
    %292 = arith.divf %290, %291 : vector<8x128xf32>
    %293 = vector.extract_strided_slice %280 {offsets = [0, 256], sizes = [8, 128], strides = [1, 1]} : vector<8x512xf32> to vector<8x128xf32>
    %294 = math.tanh %293 : vector<8x128xf32>
    %295 = vector.extract_strided_slice %280 {offsets = [0, 384], sizes = [8, 128], strides = [1, 1]} : vector<8x512xf32> to vector<8x128xf32>
    %296 = arith.negf %295 : vector<8x128xf32>
    %297 = math.exp %296 : vector<8x128xf32>
    %cst_75 = arith.constant 1.000000e+00 : f32
    %298 = vector.broadcast %cst_75 : f32 to vector<8x128xf32>
    %299 = arith.addf %298, %297 : vector<8x128xf32>
    %300 = arith.divf %298, %299 : vector<8x128xf32>
    %301 = arith.mulf %292, %265 : vector<8x128xf32>
    %302 = arith.mulf %286, %294 : vector<8x128xf32>
    %303 = arith.addf %301, %302 : vector<8x128xf32>
    %304 = math.tanh %303 : vector<8x128xf32>
    %305 = arith.mulf %300, %304 : vector<8x128xf32>
    %306 = arith.truncf %305 : vector<8x128xf32> to vector<8x128xbf16>
    %307 = arith.index_cast %c7_i32 : i32 to index
    %c0_76 = arith.constant 0 : index
    %c0_77 = arith.constant 0 : index
    %308 = vector.load %arg5[%307, %c0_76, %c0_77] : memref<8x8x128xbf16, #tpu.memory_space<vmem>>, vector<1x8x128xbf16>
    %309 = vector.shape_cast %308 : vector<1x8x128xbf16> to vector<8x128xbf16>
    %310 = vector.shape_cast %306 : vector<8x128xbf16> to vector<1x8x128xbf16>
    tpu.vector_store %arg5[%307, %c0_76, %c0_77], %310 {strides = array<i32>} : memref<8x8x128xbf16, #tpu.memory_space<vmem>>, vector<1x8x128xbf16>,
    %c8_i32 = arith.constant 8 : i32
    return
  }
  func.func @transform_0(%arg0: i32) -> (i32, i32, i32) {
    %c0_i32 = arith.constant 0 : i32
    %c0_i32_0 = arith.constant 0 : i32
    %c0_i32_1 = arith.constant 0 : i32
    %c0_i32_2 = arith.constant 0 : i32
    return %c0_i32, %c0_i32_0, %c0_i32_1 : i32, i32, i32
  }
  func.func @transform_1(%arg0: i32) -> (i32, i32) {
    %c0_i32 = arith.constant 0 : i32
    %c0_i32_0 = arith.constant 0 : i32
    %c0_i32_1 = arith.constant 0 : i32
    return %c0_i32, %c0_i32_0 : i32, i32
  }
  func.func @transform_2(%arg0: i32) -> (i32, i32) {
    %c0_i32 = arith.constant 0 : i32
    %c0_i32_0 = arith.constant 0 : i32
    %c0_i32_1 = arith.constant 0 : i32
    return %c0_i32, %c0_i32_0 : i32, i32
  }
  func.func @transform_3(%arg0: i32) -> (i32, i32) {
    %c0_i32 = arith.constant 0 : i32
    %c0_i32_0 = arith.constant 0 : i32
    %c0_i32_1 = arith.constant 0 : i32
    return %c0_i32, %c0_i32_0 : i32, i32
  }
  func.func @transform_4(%arg0: i32) -> (i32, i32, i32) {
    %c0_i32 = arith.constant 0 : i32
    %c0_i32_0 = arith.constant 0 : i32
    %c0_i32_1 = arith.constant 0 : i32
    %c0_i32_2 = arith.constant 0 : i32
    return %c0_i32, %c0_i32_0, %c0_i32_1 : i32, i32, i32
  }
}

</mosaic_0001>

<bundles_post_ra>
// kernel: tpu_custom_call.1
= control target key start
LH: loop header
LB: loop body
LE: loop exit
PB: predicated region body
PF: predicated region fallthrough
CT: control target
= control target key end

     0   :  { %9 = vsyncpa [#allocation3], 0  ;;  %s3454_s0 = inlined_call_operand.hbm [shape: bf16[8,8,128], index: 0, kind: input, shape index: {}]   ;;  %s3455_s1 = inlined_call_operand.hbm [shape: bf16[128,512], index: 1, kind: input, shape index: {}]   ;;  %s3456_s2 = inlined_call_operand.hbm [shape: bf16[128,512], index: 2, kind: input, shape index: {}]   ;;  %s3457_s3 = inlined_call_operand.vmem [shape: f32[1,512], index: 3, kind: input, shape index: {}]   ;;  %s3458_s4 = inlined_call_operand.hbm [shape: bf16[8,8,128], index: 4, kind: output, shape index: {}]  }
   0x1   :  { %10 = vsyncpa [#allocation6], 0 }
   0x2   :  { %11 = vsyncpa [#allocation4], 0  ;;  %s2529_s15 = smov [#allocation5]  }
   0x3   :  { %s29_s16 = sshll.u32 %s2529_s15, 4  ;;  %s30_s16 = int_to_ptr.vmem [resolvable:$true] %s29_s16 }
   0x4   :  { %s2451_s17 = scalar_lea.vmem %s30_s16, 4096  ;;  %p2456_p1 = scmp.lt.s32.totalorder %s30_s16, %s30_s16 }
   0x5   :  { %p2452_p0 = scmp.ne.s32.totalorder %s30_s16, %s2451_s17  ;;  %p2457_p2 = scmp.lt.s32.totalorder %s2451_s17, %s2451_s17 }
   0x7   :  { %p2458_p3 = por %p2457_p2, %p2456_p1 }
   0x9   :  { %p2459_p4 = pnand %p2458_p3, %p2452_p0 }
   0xb   :  { %2462 = shalt.err (!%p2459_p4)
}
   0xc   :  { %s2530_s18 = smov 256   ;;  %s2531_s19 = smov 16  }
   0xd   :  { %35 = dma.hbm_to_vmem [thread:$0]  %s3455_s1, 4096, %s30_s16, [#allocation6], %s2530_s18, %s2530_s18, %s2531_s19  }
   0xe   :  { %s2532_s22 = smov [#allocation2]  }
   0xf   :  { %s17_s23 = sshll.u32 %s2532_s22, 4  ;;  %s18_s23 = int_to_ptr.vmem [resolvable:$true] %s17_s23 }
  0x10   :  { %s2471_s24 = scalar_lea.vmem %s18_s23, 512  ;;  %p2476_p6 = scmp.lt.s32.totalorder %s18_s23, %s18_s23 }
  0x11   :  { %p2472_p5 = scmp.ne.s32.totalorder %s18_s23, %s2471_s24  ;;  %p2477_p7 = scmp.lt.s32.totalorder %s2471_s24, %s2471_s24 }
  0x13   :  { %p2478_p8 = por %p2477_p7, %p2476_p6 }
  0x15   :  { %p2479_p9 = pnand %p2478_p8, %p2472_p5 }
  0x17   :  { %2482 = shalt.err (!%p2479_p9)
}
  0x18   :  { %s2533_s25 = smov 64   ;;  %s2534_s26 = smov 4  }
  0x19   :  { %23 = dma.hbm_to_vmem [thread:$0]  %s3454_s0, 512, %s18_s23, [#allocation3], %s2533_s25, %s2533_s25, %s2534_s26  }
  0x1a   :  { %s2535_s1 = smov [#allocation7]  }
  0x1b   :  { %s41_s29 = sshll.u32 %s2535_s1, 4  ;;  %s42_s29 = int_to_ptr.vmem [resolvable:$true] %s41_s29 }
  0x1c   :  { %s2491_s30 = scalar_lea.vmem %s42_s29, 4096  ;;  %p2496_p11 = scmp.lt.s32.totalorder %s42_s29, %s42_s29 }
  0x1d   :  { %p2492_p10 = scmp.ne.s32.totalorder %s42_s29, %s2491_s30  ;;  %p2497_p12 = scmp.lt.s32.totalorder %s2491_s30, %s2491_s30 }
  0x1f   :  { %p2498_p13 = por %p2497_p12, %p2496_p11 }
  0x21   :  { %p2499_p0 = pnand %p2498_p13, %p2492_p10 }
  0x23   :  { %2502 = shalt.err (!%p2499_p0)
}
  0x24   :  { %47 = dma.hbm_to_vmem [thread:$0]  %s3456_s2, 4096, %s42_s29, [#allocation6], %s2530_s18, %s2530_s18, %s2531_s19  }
  0x25   :  { %2523 = dma.done.wait [#allocation3], 512  }
  0x26   :  { %2524 = vsyncadd [#allocation3], 4294966784 }
  0x27   :  { %2525 = dma.done.wait [#allocation6], 8192  }
  0x28   :  { %2526 = vsyncadd [#allocation6], 4294959104  ;;  %v3459_v0 = vmov 0   ;;  %v2577_v1 = vld [vmem:[#allocation7 + $0xe4] ss:$16 sps:$4 sm:$0xff]  }
  0x29   :  { %339 = vmatprep.mubr.bf16.mxu0 %v3459_v0  ;;  %380 = vmatprep.mubr.bf16.mxu1 %v3459_v0  ;;  %v2579_v2 = vld [vmem:[#allocation7 + $0xec] ss:$16 sps:$4 sm:$0xff]   ;;  %v2582_v3 = vld [vmem:[#allocation7 + $0xe0] ss:$16 sps:$4 sm:$0xff]   ;;  %v2584_v4 = vld [vmem:[#allocation7 + $0xe8] ss:$16 sps:$4 sm:$0xff]  }
  0x2a   :  { %307 = vmatprep.subr.bf16.mxu0 %v2577_v1  ;;  %348 = vmatprep.subr.bf16.mxu1 %v2579_v2  ;;  %v2587_v5 = vld [vmem:[#allocation7 + $0xc4] ss:$16 sps:$4 sm:$0xff]   ;;  %v2591_v6 = vld [vmem:[#allocation7 + $0xcc] ss:$16 sps:$4 sm:$0xff]   ;;  %v2593_v7 = vld [vmem:[#allocation7 + $0xc0] ss:$16 sps:$4 sm:$0xff]  }
  0x2b   :  { %308 = vmatpush1.bf16.msra.mxu0 %v2582_v3  ;;  %349 = vmatpush1.bf16.msra.mxu1 %v2584_v4  ;;  %3581 = vst [vmem:[#allocation12_spill] sm:$0xff] %v2593_v7  ;;  %v2596_v8 = vld [vmem:[#allocation7 + $0xc8] ss:$16 sps:$4 sm:$0xff]   ;;  %v2599_v9 = vld [vmem:[#allocation7 + $0xa4] ss:$16 sps:$4 sm:$0xff]  }
  0x2c   :  { %309 = vmatprep.subr.bf16.mxu0 %v2587_v5  ;;  %3582 = vst [vmem:[#allocation13_spill] sm:$0xff] %v2596_v8  ;;  %350 = vmatprep.subr.bf16.mxu1 %v2591_v6  ;;  %3583 = vst [vmem:[#allocation14_spill] sm:$0xff] %v2599_v9  ;;  %v2601_v10 = vld [vmem:[#allocation7 + $0xac] ss:$16 sps:$4 sm:$0xff]   ;;  %v2603_v11 = vld [vmem:[#allocation7 + $0xa0] ss:$16 sps:$4 sm:$0xff]  }
  0x2d   :  { %3584 = vst [vmem:[#allocation15_spill] sm:$0xff] %v2601_v10  ;;  %3585 = vst [vmem:[#allocation16_spill] sm:$0xff] %v2603_v11  ;;  %v2605_v12 = vld [vmem:[#allocation7 + $0xa8] ss:$16 sps:$4 sm:$0xff]   ;;  %v2609_v13 = vld [vmem:[#allocation7 + $0x84] ss:$16 sps:$4 sm:$0xff]  }
  0x2e   :  { %3586 = vst [vmem:[#allocation17_spill] sm:$0xff] %v2605_v12  ;;  %3587 = vst [vmem:[#allocation18_spill] sm:$0xff] %v2609_v13  ;;  %v2613_v14 = vld [vmem:[#allocation7 + $0x8c] ss:$16 sps:$4 sm:$0xff]   ;;  %v2615_v15 = vld [vmem:[#allocation7 + $0x80] ss:$16 sps:$4 sm:$0xff]  }
  0x2f   :  { %310 = vmatpush1.bf16.msra.mxu0 %v2593_v7  ;;  %351 = vmatpush1.bf16.msra.mxu1 %v2596_v8  ;;  %3588 = vst [vmem:[#allocation19_spill] sm:$0xff] %v2613_v14  ;;  %3589 = vst [vmem:[#allocation20_spill] sm:$0xff] %v2615_v15  ;;  %v2619_v16 = vld [vmem:[#allocation7 + $0x88] ss:$16 sps:$4 sm:$0xff]   ;;  %v2621_v17 = vld [vmem:[#allocation7 + $0x64] ss:$16 sps:$4 sm:$0xff]  }
  0x30   :  { %311 = vmatprep.subr.bf16.mxu0 %v2599_v9  ;;  %352 = vmatprep.subr.bf16.mxu1 %v2601_v10  ;;  %3590 = vst [vmem:[#allocation21_spill] sm:$0xff] %v2619_v16  ;;  %3591 = vst [vmem:[#allocation22_spill] sm:$0xff] %v2621_v17  ;;  %v2625_v18 = vld [vmem:[#allocation7 + $0x6c] ss:$16 sps:$4 sm:$0xff]   ;;  %v2627_v19 = vld [vmem:[#allocation7 + $0x60] ss:$16 sps:$4 sm:$0xff]  }
  0x31   :  { %3592 = vst [vmem:[#allocation23_spill] sm:$0xff] %v2625_v18  ;;  %3593 = vst [vmem:[#allocation24_spill] sm:$0xff] %v2627_v19  ;;  %v2629_v20 = vld [vmem:[#allocation7 + $0x68] ss:$16 sps:$4 sm:$0xff]   ;;  %v2633_v21 = vld [vmem:[#allocation7 + $0x44] ss:$16 sps:$4 sm:$0xff]  }
  0x32   :  { %3594 = vst [vmem:[#allocation25_spill] sm:$0xff] %v2629_v20  ;;  %3595 = vst [vmem:[#allocation26_spill] sm:$0xff] %v2633_v21  ;;  %v2637_v22 = vld [vmem:[#allocation7 + $0x4c] ss:$16 sps:$4 sm:$0xff]   ;;  %v2639_v23 = vld [vmem:[#allocation7 + $0x40] ss:$16 sps:$4 sm:$0xff]  }
  0x33   :  { %312 = vmatpush1.bf16.msra.mxu0 %v2603_v11  ;;  %353 = vmatpush1.bf16.msra.mxu1 %v2605_v12  ;;  %3596 = vst [vmem:[#allocation27_spill] sm:$0xff] %v2637_v22  ;;  %3597 = vst [vmem:[#allocation28_spill] sm:$0xff] %v2639_v23  ;;  %v2643_v24 = vld [vmem:[#allocation7 + $0x48] ss:$16 sps:$4 sm:$0xff]   ;;  %v2645_v25 = vld [vmem:[#allocation7 + $0x24] ss:$16 sps:$4 sm:$0xff]  }
  0x34   :  { %313 = vmatprep.subr.bf16.mxu0 %v2609_v13  ;;  %354 = vmatprep.subr.bf16.mxu1 %v2613_v14  ;;  %3598 = vst [vmem:[#allocation29_spill] sm:$0xff] %v2643_v24  ;;  %3599 = vst [vmem:[#allocation30_spill] sm:$0xff] %v2645_v25  ;;  %v2649_v26 = vld [vmem:[#allocation7 + $0x2c] ss:$16 sps:$4 sm:$0xff]   ;;  %v2651_v27 = vld [vmem:[#allocation7 + $0x20] ss:$16 sps:$4 sm:$0xff]  }
  0x35   :  { %3600 = vst [vmem:[#allocation31_spill] sm:$0xff] %v2649_v26  ;;  %3601 = vst [vmem:[#allocation32_spill] sm:$0xff] %v2651_v27  ;;  %v2653_v28 = vld [vmem:[#allocation7 + $0x28] ss:$16 sps:$4 sm:$0xff]   ;;  %v2657_v29 = vld [vmem:[#allocation7 + $0x4] ss:$16 sps:$4 sm:$0xff]  }
  0x36   :  { %3602 = vst [vmem:[#allocation33_spill] sm:$0xff] %v2653_v28  ;;  %3603 = vst [vmem:[#allocation34_spill] sm:$0xff] %v2657_v29  ;;  %v2661_v30 = vld [vmem:[#allocation7 + $0xc] ss:$16 sps:$4 sm:$0xff]   ;;  %v2663_v31 = vld [vmem:[#allocation7] ss:$16 sps:$4 sm:$0xff]  }
  0x37   :  { %314 = vmatpush1.bf16.msra.mxu0 %v2615_v15  ;;  %355 = vmatpush1.bf16.msra.mxu1 %v2619_v16  ;;  %3604 = vst [vmem:[#allocation35_spill] sm:$0xff] %v2661_v30  ;;  %3605 = vst [vmem:[#allocation36_spill] sm:$0xff] %v2663_v31  ;;  %v2667_v32 = vld [vmem:[#allocation7 + $0x8] ss:$16 sps:$4 sm:$0xff]   ;;  %v2669_v33 = vld [vmem:[#allocation5 + $0xe4] ss:$16 sps:$4 sm:$0xff]  }
  0x38   :  { %315 = vmatprep.subr.bf16.mxu0 %v2621_v17  ;;  %356 = vmatprep.subr.bf16.mxu1 %v2625_v18  ;;  %3606 = vst [vmem:[#allocation37_spill] sm:$0xff] %v2667_v32  ;;  %3607 = vst [vmem:[#allocation38_spill] sm:$0xff] %v2669_v33  ;;  %v2673_v34 = vld [vmem:[#allocation5 + $0xec] ss:$16 sps:$4 sm:$0xff]   ;;  %v2675_v35 = vld [vmem:[#allocation5 + $0xe0] ss:$16 sps:$4 sm:$0xff]  }
  0x39   :  { %3608 = vst [vmem:[#allocation39_spill] sm:$0xff] %v2673_v34  ;;  %v2677_v36 = vld [vmem:[#allocation5 + $0xe8] ss:$16 sps:$4 sm:$0xff]   ;;  %v2681_v37 = vld [vmem:[#allocation5 + $0xc4] ss:$16 sps:$4 sm:$0xff]  }
  0x3a   :  { %v2685_v38 = vld [vmem:[#allocation5 + $0xcc] ss:$16 sps:$4 sm:$0xff]   ;;  %v2689_v39 = vld [vmem:[#allocation5 + $0xc0] ss:$16 sps:$4 sm:$0xff]   ;;  %v2693_v40 = vld [vmem:[#allocation5 + $0xc8] ss:$16 sps:$4 sm:$0xff]  }
  0x3b   :  { %316 = vmatpush1.bf16.msra.mxu0 %v2627_v19  ;;  %357 = vmatpush1.bf16.msra.mxu1 %v2629_v20  ;;  %v2695_v41 = vld [vmem:[#allocation5 + $0xa4] ss:$16 sps:$4 sm:$0xff]   ;;  %v2699_v42 = vld [vmem:[#allocation5 + $0xac] ss:$16 sps:$4 sm:$0xff]   ;;  %v2703_v43 = vld [vmem:[#allocation5 + $0xa0] ss:$16 sps:$4 sm:$0xff]  }
  0x3c   :  { %317 = vmatprep.subr.bf16.mxu0 %v2633_v21  ;;  %358 = vmatprep.subr.bf16.mxu1 %v2637_v22  ;;  %v2705_v44 = vld [vmem:[#allocation5 + $0xa8] ss:$16 sps:$4 sm:$0xff]   ;;  %v2709_v45 = vld [vmem:[#allocation5 + $0x84] ss:$16 sps:$4 sm:$0xff]   ;;  %v2713_v46 = vld [vmem:[#allocation5 + $0x8c] ss:$16 sps:$4 sm:$0xff]  }
  0x3d   :  { %v2717_v47 = vld [vmem:[#allocation5 + $0x80] ss:$16 sps:$4 sm:$0xff]   ;;  %v2719_v48 = vld [vmem:[#allocation5 + $0x88] ss:$16 sps:$4 sm:$0xff]   ;;  %v2723_v49 = vld [vmem:[#allocation5 + $0x64] ss:$16 sps:$4 sm:$0xff]  }
  0x3e   :  { %v2725_v50 = vld [vmem:[#allocation5 + $0x6c] ss:$16 sps:$4 sm:$0xff]   ;;  %v2729_v51 = vld [vmem:[#allocation5 + $0x60] ss:$16 sps:$4 sm:$0xff]   ;;  %v2731_v52 = vld [vmem:[#allocation5 + $0x68] ss:$16 sps:$4 sm:$0xff]  }
  0x3f   :  { %318 = vmatpush1.bf16.msra.mxu0 %v2639_v23  ;;  %359 = vmatpush1.bf16.msra.mxu1 %v2643_v24  ;;  %v2735_v53 = vld [vmem:[#allocation5 + $0x44] ss:$16 sps:$4 sm:$0xff]   ;;  %v2737_v54 = vld [vmem:[#allocation5 + $0x4c] ss:$16 sps:$4 sm:$0xff]   ;;  %v2741_v55 = vld [vmem:[#allocation5 + $0x40] ss:$16 sps:$4 sm:$0xff]  }
  0x40   :  { %319 = vmatprep.subr.bf16.mxu0 %v2645_v25  ;;  %360 = vmatprep.subr.bf16.mxu1 %v2649_v26  ;;  %v2743_v56 = vld [vmem:[#allocation5 + $0x48] ss:$16 sps:$4 sm:$0xff]   ;;  %v2747_v57 = vld [vmem:[#allocation5 + $0x24] ss:$16 sps:$4 sm:$0xff]   ;;  %v2749_v58 = vld [vmem:[#allocation5 + $0x2c] ss:$16 sps:$4 sm:$0xff]  }
  0x41   :  { %3609 = vst [vmem:[#allocation40_spill] sm:$0xff] %v2749_v58  ;;  %v2753_v59 = vld [vmem:[#allocation5 + $0x20] ss:$16 sps:$4 sm:$0xff]   ;;  %v2755_v60 = vld [vmem:[#allocation5 + $0x28] ss:$16 sps:$4 sm:$0xff]  }
  0x42   :  { %v2759_v61 = vld [vmem:[#allocation5 + $0x4] ss:$16 sps:$4 sm:$0xff]   ;;  %v2761_v62 = vld [vmem:[#allocation5 + $0xc] ss:$16 sps:$4 sm:$0xff]   ;;  %v2765_v63 = vld [vmem:[#allocation5] ss:$16 sps:$4 sm:$0xff]  }
  0x43   :  { %320 = vmatpush1.bf16.msra.mxu0 %v2651_v27  ;;  %361 = vmatpush1.bf16.msra.mxu1 %v2653_v28  ;;  %3610 = vst [vmem:[#allocation41_spill] sm:$0xff] %v2761_v62 }
  0x44   :  { %321 = vmatprep.subr.bf16.mxu0 %v2657_v29  ;;  %362 = vmatprep.subr.bf16.mxu1 %v2661_v30 }
  0x47   :  { %322 = vmatpush1.bf16.msra.mxu0 %v2663_v31  ;;  %363 = vmatpush1.bf16.msra.mxu1 %v2667_v32 }
  0x48   :  { %549 = vmatprep.subr.bf16.mxu0 %v2669_v33  ;;  %590 = vmatprep.subr.bf16.mxu1 %v2673_v34 }
  0x4a   :  { %340 = vmatmul.mubr.bf16.vlgmr.msra.gmra.mxu0 %v3459_v0  ;;  %381 = vmatmul.mubr.bf16.vlgmr.msra.gmra.mxu1 %v3459_v0 }
  0x4b   :  { %550 = vmatpush1.bf16.msra.mxu0 %v2675_v35  ;;  %591 = vmatpush1.bf16.msra.mxu1 %v2677_v36 }
  0x4c   :  { %551 = vmatprep.subr.bf16.mxu0 %v2681_v37  ;;  %592 = vmatprep.subr.bf16.mxu1 %v2685_v38 }
  0x4d   :  { %581 = vmatprep.mubr.bf16.mxu0 %v3459_v0  ;;  %622 = vmatprep.mubr.bf16.mxu1 %v3459_v0  ;;  %v2767_v0 = vld [vmem:[#allocation5 + $0x8] ss:$16 sps:$4 sm:$0xff]  }
  0x4f   :  { %552 = vmatpush1.bf16.msra.mxu0 %v2689_v39  ;;  %593 = vmatpush1.bf16.msra.mxu1 %v2693_v40 }
  0x50   :  { %553 = vmatprep.subr.bf16.mxu0 %v2695_v41  ;;  %594 = vmatprep.subr.bf16.mxu1 %v2699_v42 }
  0x53   :  { %554 = vmatpush1.bf16.msra.mxu0 %v2703_v43  ;;  %595 = vmatpush1.bf16.msra.mxu1 %v2705_v44 }
  0x54   :  { %555 = vmatprep.subr.bf16.mxu0 %v2709_v45  ;;  %596 = vmatprep.subr.bf16.mxu1 %v2713_v46 }
  0x57   :  { %556 = vmatpush1.bf16.msra.mxu0 %v2717_v47  ;;  %597 = vmatpush1.bf16.msra.mxu1 %v2719_v48 }
  0x58   :  { %557 = vmatprep.subr.bf16.mxu0 %v2723_v49  ;;  %598 = vmatprep.subr.bf16.mxu1 %v2725_v50 }
  0x5b   :  { %558 = vmatpush1.bf16.msra.mxu0 %v2729_v51  ;;  %599 = vmatpush1.bf16.msra.mxu1 %v2731_v52 }
  0x5c   :  { %559 = vmatprep.subr.bf16.mxu0 %v2735_v53  ;;  %600 = vmatprep.subr.bf16.mxu1 %v2737_v54 }
  0x5f   :  { %560 = vmatpush1.bf16.msra.mxu0 %v2741_v55  ;;  %601 = vmatpush1.bf16.msra.mxu1 %v2743_v56 }
  0x60   :  { %561 = vmatprep.subr.bf16.mxu0 %v2747_v57  ;;  %602 = vmatprep.subr.bf16.mxu1 %v2749_v58  ;;  %v146_v58 = vld [vmem:[#allocation2] sm:$0xf] }
  0x63   :  { %562 = vmatpush1.bf16.msra.mxu0 %v2753_v59  ;;  %603 = vmatpush1.bf16.msra.mxu1 %v2755_v60 }
  0x64   :  { %563 = vmatprep.subr.bf16.mxu0 %v2759_v61  ;;  %604 = vmatprep.subr.bf16.mxu1 %v2761_v62  ;;  %v3611_v62 = vmov 0  }
  0x67   :  { %564 = vmatpush1.bf16.msra.mxu0 %v2765_v63  ;;  %605 = vmatpush1.bf16.msra.mxu1 %v2767_v0 }
  0x68   :  { %663 = vmatprep.subr.bf16.mxu0 %v2577_v1  ;;  %704 = vmatprep.subr.bf16.mxu1 %v2579_v2 }
  0x6a   :  { %582 = vmatmul.mubr.bf16.vlgmr.msra.gmra.mxu0 %v146_v58  ;;  %623 = vmatmul.mubr.bf16.vlgmr.msra.gmra.mxu1 %v146_v58 }
  0x6b   :  { %664 = vmatpush1.bf16.msra.mxu0 %v2582_v3  ;;  %705 = vmatpush1.bf16.msra.mxu1 %v2584_v4 }
  0x6c   :  { %665 = vmatprep.subr.bf16.mxu0 %v2587_v5  ;;  %706 = vmatprep.subr.bf16.mxu1 %v2591_v6 }
  0x6d   :  { %695 = vmatprep.mubr.bf16.mxu0 %v3611_v62  ;;  %736 = vmatprep.mubr.bf16.mxu1 %v3611_v62 }
  0x6f   :  { %666 = vmatpush1.bf16.msra.mxu0 %v2593_v7  ;;  %707 = vmatpush1.bf16.msra.mxu1 %v2596_v8 }
  0x70   :  { %667 = vmatprep.subr.bf16.mxu0 %v2599_v9  ;;  %708 = vmatprep.subr.bf16.mxu1 %v2601_v10 }
  0x73   :  { %668 = vmatpush1.bf16.msra.mxu0 %v2603_v11  ;;  %709 = vmatpush1.bf16.msra.mxu1 %v2605_v12 }
  0x74   :  { %669 = vmatprep.subr.bf16.mxu0 %v2609_v13  ;;  %710 = vmatprep.subr.bf16.mxu1 %v2613_v14 }
  0x77   :  { %670 = vmatpush1.bf16.msra.mxu0 %v2615_v15  ;;  %711 = vmatpush1.bf16.msra.mxu1 %v2619_v16 }
  0x78   :  { %671 = vmatprep.subr.bf16.mxu0 %v2621_v17  ;;  %712 = vmatprep.subr.bf16.mxu1 %v2625_v18 }
  0x7b   :  { %672 = vmatpush1.bf16.msra.mxu0 %v2627_v19  ;;  %713 = vmatpush1.bf16.msra.mxu1 %v2629_v20 }
  0x7c   :  { %673 = vmatprep.subr.bf16.mxu0 %v2633_v21  ;;  %714 = vmatprep.subr.bf16.mxu1 %v2637_v22  ;;  %v126_v21 = vlaneseq }
  0x7f   :  { %674 = vmatpush1.bf16.msra.mxu0 %v2639_v23  ;;  %715 = vmatpush1.bf16.msra.mxu1 %v2643_v24 }
  0x80   :  { %675 = vmatprep.subr.bf16.mxu0 %v2645_v25  ;;  %716 = vmatprep.subr.bf16.mxu1 %v2649_v26 }
  0x83   :  { %676 = vmatpush1.bf16.msra.mxu0 %v2651_v27  ;;  %717 = vmatpush1.bf16.msra.mxu1 %v2653_v28 }
  0x84   :  { %677 = vmatprep.subr.bf16.mxu0 %v2657_v29  ;;  %718 = vmatprep.subr.bf16.mxu1 %v2661_v30  ;;  %v127_v29 = vshrl.u32 %v126_v21, 7 }
  0x86   :  { %v128_v20 = vsub.s32 0, %v127_v29  ;;  %v140_v14 = vsub.s32 3, %v127_v29 }
  0x87   :  { %678 = vmatpush1.bf16.msra.mxu0 %v2663_v31  ;;  %719 = vmatpush1.bf16.msra.mxu1 %v2667_v32  ;;  %v124_v31 = vld [vmem:[%s3457_s3] sm:$0xf]  ;;  %v132_v32 = vsub.s32 1, %v127_v29  ;;  %s2537_s3 = smov [#allocation8]  }
  0x88   :  { %745 = vmatprep.subr.bf16.mxu0 %v2669_v33  ;;  %786 = vmatprep.subr.bf16.mxu1 %v2673_v34  ;;  %v2812_v30 = vrot.slane %v124_v31, %v128_v20  ;;  %v2818_v11 = vrot.slane %v124_v31, %v140_v14  ;;  %s2045_s7 = sshll.u32 %s2537_s3, 4  ;;  %s2046_s7 = int_to_ptr.vmem [resolvable:$true] %s2045_s7 }
  0x89   :  { %v2814_v18 = vrot.slane %v124_v31, %v132_v32  ;;  %s2503_s8 = scalar_lea.vmem %s2046_s7, 512  ;;  %p2508_p2 = scmp.lt.s32.totalorder %s2046_s7, %s2046_s7 }
  0x8a   :  { %p2504_p1 = scmp.ne.s32.totalorder %s2046_s7, %s2503_s8  ;;  %p2509_p3 = scmp.lt.s32.totalorder %s2503_s8, %s2503_s8 }
  0x8c   :  { %p2510_p4 = por %p2509_p3, %p2508_p2 }
  0x8e   :  { %p2511_p5 = pnand %p2510_p4, %p2504_p1 }
 0x10a   :  { %v341_v58 = vpop.f32.mrf.mxu0  ;;  %v382_v25 = vpop.f32.mrf.mxu1 }
 0x10c   :  { %v343_v24 = vpop.f32.mrf.mxu0  ;;  %v384_v26 = vpop.f32.mrf.mxu1 }
 0x10e   :  { %v345_v23 = vpop.f32.mrf.mxu0  ;;  %v386_v27 = vpop.f32.mrf.mxu1 }
 0x110   :  { %v346_v22 = vpop.f32.mrf.mxu0  ;;  %v387_v28 = vpop.f32.mrf.mxu1 }
 0x12a   :  { %v583_v33 = vpop.f32.mrf.mxu0  ;;  %v624_v34 = vpop.f32.mrf.mxu1 }
 0x12b   :  { %v584_v19 = vadd.f32 %v583_v33, %v341_v58  ;;  %v136_v33 = vsub.s32 2, %v127_v29 }
 0x12c   :  { %v585_v17 = vpop.f32.mrf.mxu0  ;;  %v626_v23 = vpop.f32.mrf.mxu1 }
 0x12d   :  { %v631_v22 = vadd.f32 %v584_v19, %v2812_v30  ;;  %v586_v27 = vadd.f32 %v585_v17, %v343_v24  ;;  %v627_v32 = vadd.f32 %v626_v23, %v384_v26  ;;  %v2821_v10 = vrot.slane %v124_v31, %v136_v33  ;;  %v3613_v33 = vld [vmem:[#allocation41_spill] sm:$0xff] }
 0x12e   :  { %v587_v28 = vpop.f32.mrf.mxu0  ;;  %v628_v21 = vpop.f32.mrf.mxu1  ;;  %v625_v17 = vadd.f32 %v624_v34, %v382_v25 }
 0x12f   :  { %v2122_v16 = vmul.f32 -1.442695, %v631_v22  ;;  %v632_v15 = vadd.f32 %v586_v27, %v2814_v18  ;;  %v634_v58 = vadd.f32 %v627_v32, %v2818_v11  ;;  %v3612_v32 = vld [vmem:[#allocation40_spill] sm:$0xff] }
 0x130   :  { %v588_v13 = vpop.f32.mrf.mxu0  ;;  %v629_v12 = vpop.f32.mrf.mxu1  ;;  %v633_v22 = vadd.f32 %v625_v17, %v2821_v10  ;;  %v3614_v17 = vld [vmem:[#allocation15_spill] sm:$0xff] }
 0x131   :  { %2251 = vpow2.f32 %v2122_v16  ;;  %v2123_v20 = vmul.f32 -1.442695, %v632_v15  ;;  %v2124_v19 = vmul.f32 -1.442695, %v634_v58  ;;  %v662_v58 = vld [vmem:[#allocation2 + $0x4] sm:$0xf] }
 0x133   :  { %2253 = vpow2.f32 %v2123_v20 }
 0x134   :  { %2255 = vpow2.f32 %v2124_v19  ;;  %v3615_v19 = vld [vmem:[#allocation16_spill] sm:$0xff] }
 0x13e   :  { %v2252_v24 = vpop.eup %2251 }
 0x13f   :  { %v638_v27 = vadd.f32 1.0, %v2252_v24  ;;  %v3616_v24 = vld [vmem:[#allocation17_spill] sm:$0xff] }
 0x140   :  { %v2254_v28 = vpop.eup %2253 }
 0x141   :  { %2257 = vrcp.f32 %v638_v27  ;;  %v644_v12 = vadd.f32 1.0, %v2254_v28  ;;  %v2256_v13 = vpop.eup %2255  ;;  %v3618_v27 = vld [vmem:[#allocation19_spill] sm:$0xff]  ;;  %v3619_v28 = vld [vmem:[#allocation20_spill] sm:$0xff] }
 0x142   :  { %2259 = vtanh.f32 %v633_v22  ;;  %v651_v26 = vadd.f32 1.0, %v2256_v13  ;;  %v3617_v22 = vld [vmem:[#allocation18_spill] sm:$0xff] }
 0x143   :  { %2261 = vrcp.f32 %v644_v12  ;;  %v3620_v12 = vld [vmem:[#allocation21_spill] sm:$0xff]  ;;  %v3621_v13 = vld [vmem:[#allocation22_spill] sm:$0xff] }
 0x144   :  { %2263 = vrcp.f32 %v651_v26  ;;  %v3625_v26 = vld [vmem:[#allocation26_spill] sm:$0xff] }
 0x14e   :  { %v2258_v14 = vpop.eup %2257 }
 0x14f   :  { %v2260_v15 = vpop.eup %2259 }
 0x150   :  { %v2262_v16 = vpop.eup %2261  ;;  %v655_v31 = vmul.f32 %v2260_v15, %v2258_v14  ;;  %v3622_v14 = vld [vmem:[#allocation23_spill] sm:$0xff]  ;;  %v3623_v15 = vld [vmem:[#allocation24_spill] sm:$0xff] }
 0x151   :  { %v654_v29 = vmul.f32 0.0, %v2262_v16  ;;  %v2264_v25 = vpop.eup %2263  ;;  %v3624_v16 = vld [vmem:[#allocation25_spill] sm:$0xff] }
 0x153   :  { %v2824_v23 = vadd.f32 %v655_v31, %v654_v29  ;;  %v3626_v29 = vld [vmem:[#allocation27_spill] sm:$0xff]  ;;  %v3627_v31 = vld [vmem:[#allocation28_spill] sm:$0xff] }
 0x155   :  { %2265 = vtanh.f32 %v2824_v23 }
 0x162   :  { %v2266_v34 = vpop.eup %2265 }
 0x163   :  { %v658_v21 = vmul.f32 %v2266_v34, %v2264_v25  ;;  %v3628_v25 = vld [vmem:[#allocation29_spill] sm:$0xff]  ;;  %v3629_v34 = vld [vmem:[#allocation30_spill] sm:$0xff] }
 0x165   :  { %v659_v20 = vpack.c.bf16 %v658_v21, %v658_v21  ;;  %v3630_v21 = vld [vmem:[#allocation31_spill] sm:$0xff] }
 0x167   :  { %660 = vst [vmem:[#allocation8] sm:$0xf] %v659_v20  ;;  %696 = vmatmul.mubr.bf16.vlgmr.msra.gmra.mxu0 %v659_v20  ;;  %737 = vmatmul.mubr.bf16.vlgmr.msra.gmra.mxu1 %v659_v20  ;;  %v3631_v20 = vld [vmem:[#allocation32_spill] sm:$0xff] }
 0x168   :  { %746 = vmatpush1.bf16.msra.mxu0 %v2675_v35  ;;  %787 = vmatpush1.bf16.msra.mxu1 %v2677_v36 }
 0x169   :  { %747 = vmatprep.subr.bf16.mxu0 %v2681_v37  ;;  %788 = vmatprep.subr.bf16.mxu1 %v2685_v38 }
 0x16a   :  { %777 = vmatprep.mubr.bf16.mxu0 %v3611_v62  ;;  %818 = vmatprep.mubr.bf16.mxu1 %v3611_v62 }
 0x16c   :  { %748 = vmatpush1.bf16.msra.mxu0 %v2689_v39  ;;  %789 = vmatpush1.bf16.msra.mxu1 %v2693_v40 }
 0x16d   :  { %749 = vmatprep.subr.bf16.mxu0 %v2695_v41  ;;  %790 = vmatprep.subr.bf16.mxu1 %v2699_v42 }
 0x170   :  { %750 = vmatpush1.bf16.msra.mxu0 %v2703_v43  ;;  %791 = vmatpush1.bf16.msra.mxu1 %v2705_v44 }
 0x171   :  { %751 = vmatprep.subr.bf16.mxu0 %v2709_v45  ;;  %792 = vmatprep.subr.bf16.mxu1 %v2713_v46 }
 0x174   :  { %752 = vmatpush1.bf16.msra.mxu0 %v2717_v47  ;;  %793 = vmatpush1.bf16.msra.mxu1 %v2719_v48 }
 0x175   :  { %753 = vmatprep.subr.bf16.mxu0 %v2723_v49  ;;  %794 = vmatprep.subr.bf16.mxu1 %v2725_v50 }
 0x178   :  { %754 = vmatpush1.bf16.msra.mxu0 %v2729_v51  ;;  %795 = vmatpush1.bf16.msra.mxu1 %v2731_v52 }
 0x179   :  { %755 = vmatprep.subr.bf16.mxu0 %v2735_v53  ;;  %796 = vmatprep.subr.bf16.mxu1 %v2737_v54 }
 0x17c   :  { %756 = vmatpush1.bf16.msra.mxu0 %v2741_v55  ;;  %797 = vmatpush1.bf16.msra.mxu1 %v2743_v56 }
 0x17d   :  { %757 = vmatprep.subr.bf16.mxu0 %v2747_v57  ;;  %798 = vmatprep.subr.bf16.mxu1 %v3612_v32 }
 0x180   :  { %758 = vmatpush1.bf16.msra.mxu0 %v2753_v59  ;;  %799 = vmatpush1.bf16.msra.mxu1 %v2755_v60 }
 0x181   :  { %759 = vmatprep.subr.bf16.mxu0 %v2759_v61  ;;  %800 = vmatprep.subr.bf16.mxu1 %v3613_v33 }
 0x184   :  { %760 = vmatpush1.bf16.msra.mxu0 %v2765_v63  ;;  %801 = vmatpush1.bf16.msra.mxu1 %v2767_v0 }
 0x185   :  { %860 = vmatprep.subr.bf16.mxu0 %v2577_v1  ;;  %901 = vmatprep.subr.bf16.mxu1 %v2579_v2 }
 0x187   :  { %778 = vmatmul.mubr.bf16.vlgmr.msra.gmra.mxu0 %v662_v58  ;;  %819 = vmatmul.mubr.bf16.vlgmr.msra.gmra.mxu1 %v662_v58  ;;  %v3632_v58 = vld [vmem:[#allocation33_spill] sm:$0xff] }
 0x188   :  { %861 = vmatpush1.bf16.msra.mxu0 %v2582_v3  ;;  %902 = vmatpush1.bf16.msra.mxu1 %v2584_v4 }
 0x189   :  { %862 = vmatprep.subr.bf16.mxu0 %v2587_v5  ;;  %903 = vmatprep.subr.bf16.mxu1 %v2591_v6 }
 0x18a   :  { %892 = vmatprep.mubr.bf16.mxu0 %v3611_v62  ;;  %933 = vmatprep.mubr.bf16.mxu1 %v3611_v62 }
 0x18c   :  { %863 = vmatpush1.bf16.msra.mxu0 %v2593_v7  ;;  %904 = vmatpush1.bf16.msra.mxu1 %v2596_v8 }
 0x18d   :  { %864 = vmatprep.subr.bf16.mxu0 %v2599_v9  ;;  %905 = vmatprep.subr.bf16.mxu1 %v3614_v17 }
 0x190   :  { %865 = vmatpush1.bf16.msra.mxu0 %v3615_v19  ;;  %906 = vmatpush1.bf16.msra.mxu1 %v3616_v24 }
 0x191   :  { %866 = vmatprep.subr.bf16.mxu0 %v3617_v22  ;;  %907 = vmatprep.subr.bf16.mxu1 %v3618_v27 }
 0x194   :  { %867 = vmatpush1.bf16.msra.mxu0 %v3619_v28  ;;  %908 = vmatpush1.bf16.msra.mxu1 %v3620_v12 }
 0x195   :  { %868 = vmatprep.subr.bf16.mxu0 %v3621_v13  ;;  %909 = vmatprep.subr.bf16.mxu1 %v3622_v14  ;;  %v3633_v14 = vld [vmem:[#allocation34_spill] sm:$0xff] }
 0x198   :  { %869 = vmatpush1.bf16.msra.mxu0 %v3623_v15  ;;  %910 = vmatpush1.bf16.msra.mxu1 %v3624_v16  ;;  %v3634_v15 = vld [vmem:[#allocation35_spill] sm:$0xff]  ;;  %v3635_v16 = vld [vmem:[#allocation36_spill] sm:$0xff] }
 0x199   :  { %870 = vmatprep.subr.bf16.mxu0 %v3625_v26  ;;  %911 = vmatprep.subr.bf16.mxu1 %v3626_v29  ;;  %v3636_v26 = vld [vmem:[#allocation37_spill] sm:$0xff]  ;;  %v3637_v29 = vld [vmem:[#allocation38_spill] sm:$0xff] }
 0x19c   :  { %871 = vmatpush1.bf16.msra.mxu0 %v3627_v31  ;;  %912 = vmatpush1.bf16.msra.mxu1 %v3628_v25  ;;  %v3638_v31 = vld [vmem:[#allocation39_spill] sm:$0xff] }
 0x19d   :  { %872 = vmatprep.subr.bf16.mxu0 %v3629_v34  ;;  %913 = vmatprep.subr.bf16.mxu1 %v3630_v21 }
 0x1a0   :  { %873 = vmatpush1.bf16.msra.mxu0 %v3631_v20  ;;  %914 = vmatpush1.bf16.msra.mxu1 %v3632_v58 }
 0x1a1   :  { %874 = vmatprep.subr.bf16.mxu0 %v3633_v14  ;;  %915 = vmatprep.subr.bf16.mxu1 %v3634_v15 }
 0x1a4   :  { %875 = vmatpush1.bf16.msra.mxu0 %v3635_v16  ;;  %916 = vmatpush1.bf16.msra.mxu1 %v3636_v26 }
 0x1a5   :  { %942 = vmatprep.subr.bf16.mxu0 %v3637_v29  ;;  %983 = vmatprep.subr.bf16.mxu1 %v3638_v31 }
 0x227   :  { %v697_v25 = vpop.f32.mrf.mxu0  ;;  %v738_v34 = vpop.f32.mrf.mxu1 }
 0x229   :  { %v699_v13 = vpop.f32.mrf.mxu0  ;;  %v740_v21 = vpop.f32.mrf.mxu1 }
 0x22b   :  { %v701_v12 = vpop.f32.mrf.mxu0  ;;  %v742_v20 = vpop.f32.mrf.mxu1 }
 0x22d   :  { %v702_v28 = vpop.f32.mrf.mxu0  ;;  %v743_v58 = vpop.f32.mrf.mxu1 }
 0x247   :  { %v779_v27 = vpop.f32.mrf.mxu0  ;;  %v820_v14 = vpop.f32.mrf.mxu1 }
 0x248   :  { %v780_v22 = vadd.f32 %v779_v27, %v697_v25  ;;  %v821_v58 = vadd.f32 %v820_v14, %v738_v34 }
 0x249   :  { %v781_v15 = vpop.f32.mrf.mxu0  ;;  %v822_v24 = vpop.f32.mrf.mxu1 }
 0x24a   :  { %v827_v16 = vadd.f32 %v780_v22, %v2812_v30  ;;  %v782_v26 = vadd.f32 %v781_v15, %v699_v13  ;;  %v823_v28 = vadd.f32 %v822_v24, %v740_v21  ;;  %v829_v7 = vadd.f32 %v821_v58, %v2821_v10  ;;  %v3649_v58 = vld [vmem:[#allocation22_spill] sm:$0xff] }
 0x24b   :  { %v783_v19 = vpop.f32.mrf.mxu0  ;;  %v824_v29 = vpop.f32.mrf.mxu1 }
 0x24c   :  { %v2125_v17 = vmul.f32 -1.442695, %v827_v16  ;;  %v828_v31 = vadd.f32 %v782_v26, %v2814_v18  ;;  %v830_v20 = vadd.f32 %v823_v28, %v2818_v11  ;;  %v3643_v28 = vld [vmem:[#allocation16_spill] sm:$0xff] }
 0x24d   :  { %v784_v9 = vpop.f32.mrf.mxu0  ;;  %v825_v8 = vpop.f32.mrf.mxu1 }
 0x24e   :  { %2267 = vpow2.f32 %v2125_v17  ;;  %v2126_v12 = vmul.f32 -1.442695, %v828_v31  ;;  %v2127_v27 = vmul.f32 -1.442695, %v830_v20  ;;  %v3648_v20 = vld [vmem:[#allocation21_spill] sm:$0xff] }
 0x250   :  { %2269 = vpow2.f32 %v2126_v12  ;;  %v3640_v12 = vld [vmem:[#allocation13_spill] sm:$0xff] }
 0x251   :  { %2271 = vpow2.f32 %v2127_v27  ;;  %v3650_v27 = vld [vmem:[#allocation23_spill] sm:$0xff] }
 0x25b   :  { %v2268_v25 = vpop.eup %2267 }
 0x25c   :  { %v834_v22 = vadd.f32 1.0, %v2268_v25  ;;  %v3651_v25 = vld [vmem:[#allocation24_spill] sm:$0xff] }
 0x25d   :  { %v2270_v13 = vpop.eup %2269 }
 0x25e   :  { %2273 = vrcp.f32 %v834_v22  ;;  %v840_v19 = vadd.f32 1.0, %v2270_v13  ;;  %v2272_v9 = vpop.eup %2271  ;;  %v3652_v22 = vld [vmem:[#allocation25_spill] sm:$0xff]  ;;  %v3653_v13 = vld [vmem:[#allocation26_spill] sm:$0xff] }
 0x25f   :  { %2275 = vtanh.f32 %v829_v7  ;;  %v847_v16 = vadd.f32 1.0, %v2272_v9  ;;  %v859_v7 = vld [vmem:[#allocation2 + $0x8] sm:$0xf]  ;;  %v3655_v9 = vld [vmem:[#allocation28_spill] sm:$0xff] }
 0x260   :  { %2277 = vrcp.f32 %v840_v19  ;;  %v3654_v19 = vld [vmem:[#allocation27_spill] sm:$0xff] }
 0x261   :  { %2279 = vrcp.f32 %v847_v16  ;;  %v3659_v16 = vld [vmem:[#allocation32_spill] sm:$0xff] }
 0x26b   :  { %v2274_v8 = vpop.eup %2273 }
 0x26c   :  { %v2276_v17 = vpop.eup %2275 }
 0x26d   :  { %v2278_v15 = vpop.eup %2277  ;;  %v851_v24 = vmul.f32 %v2276_v17, %v2274_v8  ;;  %v3656_v8 = vld [vmem:[#allocation29_spill] sm:$0xff]  ;;  %v3657_v17 = vld [vmem:[#allocation30_spill] sm:$0xff] }
 0x26e   :  { %v850_v26 = vmul.f32 %v2278_v15, %v2824_v23  ;;  %v2280_v29 = vpop.eup %2279  ;;  %v3639_v23 = vld [vmem:[#allocation12_spill] sm:$0xff]  ;;  %v3658_v15 = vld [vmem:[#allocation31_spill] sm:$0xff] }
 0x270   :  { %v2900_v14 = vadd.f32 %v851_v24, %v850_v26  ;;  %v3660_v24 = vld [vmem:[#allocation33_spill] sm:$0xff]  ;;  %v3661_v26 = vld [vmem:[#allocation34_spill] sm:$0xff] }
 0x272   :  { %2281 = vtanh.f32 %v2900_v14 }
 0x27f   :  { %v2282_v31 = vpop.eup %2281 }
 0x280   :  { %v854_v34 = vmul.f32 %v2282_v31, %v2280_v29  ;;  %v3662_v29 = vld [vmem:[#allocation35_spill] sm:$0xff]  ;;  %v3663_v31 = vld [vmem:[#allocation36_spill] sm:$0xff] }
 0x282   :  { %v855_v21 = vpack.c.bf16 %v854_v34, %v854_v34  ;;  %v3664_v34 = vld [vmem:[#allocation37_spill] sm:$0xff] }
 0x284   :  { %857 = vst [vmem:[#allocation8 + $0x4] sm:$0xf] %v855_v21  ;;  %893 = vmatmul.mubr.bf16.vlgmr.msra.gmra.mxu0 %v855_v21  ;;  %934 = vmatmul.mubr.bf16.vlgmr.msra.gmra.mxu1 %v855_v21  ;;  %v3665_v21 = vld [vmem:[#allocation38_spill] sm:$0xff] }
 0x285   :  { %943 = vmatpush1.bf16.msra.mxu0 %v2675_v35  ;;  %984 = vmatpush1.bf16.msra.mxu1 %v2677_v36 }
 0x286   :  { %944 = vmatprep.subr.bf16.mxu0 %v2681_v37  ;;  %985 = vmatprep.subr.bf16.mxu1 %v2685_v38 }
 0x287   :  { %974 = vmatprep.mubr.bf16.mxu0 %v3611_v62  ;;  %1015 = vmatprep.mubr.bf16.mxu1 %v3611_v62 }
 0x289   :  { %945 = vmatpush1.bf16.msra.mxu0 %v2689_v39  ;;  %986 = vmatpush1.bf16.msra.mxu1 %v2693_v40 }
 0x28a   :  { %946 = vmatprep.subr.bf16.mxu0 %v2695_v41  ;;  %987 = vmatprep.subr.bf16.mxu1 %v2699_v42 }
 0x28d   :  { %947 = vmatpush1.bf16.msra.mxu0 %v2703_v43  ;;  %988 = vmatpush1.bf16.msra.mxu1 %v2705_v44 }
 0x28e   :  { %948 = vmatprep.subr.bf16.mxu0 %v2709_v45  ;;  %989 = vmatprep.subr.bf16.mxu1 %v2713_v46 }
 0x291   :  { %949 = vmatpush1.bf16.msra.mxu0 %v2717_v47  ;;  %990 = vmatpush1.bf16.msra.mxu1 %v2719_v48 }
 0x292   :  { %950 = vmatprep.subr.bf16.mxu0 %v2723_v49  ;;  %991 = vmatprep.subr.bf16.mxu1 %v2725_v50 }
 0x295   :  { %951 = vmatpush1.bf16.msra.mxu0 %v2729_v51  ;;  %992 = vmatpush1.bf16.msra.mxu1 %v2731_v52 }
 0x296   :  { %952 = vmatprep.subr.bf16.mxu0 %v2735_v53  ;;  %993 = vmatprep.subr.bf16.mxu1 %v2737_v54 }
 0x299   :  { %953 = vmatpush1.bf16.msra.mxu0 %v2741_v55  ;;  %994 = vmatpush1.bf16.msra.mxu1 %v2743_v56 }
 0x29a   :  { %954 = vmatprep.subr.bf16.mxu0 %v2747_v57  ;;  %995 = vmatprep.subr.bf16.mxu1 %v3612_v32 }
 0x29d   :  { %955 = vmatpush1.bf16.msra.mxu0 %v2753_v59  ;;  %996 = vmatpush1.bf16.msra.mxu1 %v2755_v60 }
 0x29e   :  { %956 = vmatprep.subr.bf16.mxu0 %v2759_v61  ;;  %997 = vmatprep.subr.bf16.mxu1 %v3613_v33 }
 0x2a1   :  { %957 = vmatpush1.bf16.msra.mxu0 %v2765_v63  ;;  %998 = vmatpush1.bf16.msra.mxu1 %v2767_v0 }
 0x2a2   :  { %1057 = vmatprep.subr.bf16.mxu0 %v2577_v1  ;;  %1098 = vmatprep.subr.bf16.mxu1 %v2579_v2  ;;  %v3641_v1 = vld [vmem:[#allocation14_spill] sm:$0xff]  ;;  %v3642_v2 = vld [vmem:[#allocation15_spill] sm:$0xff] }
 0x2a4   :  { %975 = vmatmul.mubr.bf16.vlgmr.msra.gmra.mxu0 %v859_v7  ;;  %1016 = vmatmul.mubr.bf16.vlgmr.msra.gmra.mxu1 %v859_v7  ;;  %v3666_v7 = vld [vmem:[#allocation39_spill] sm:$0xff] }
 0x2a5   :  { %1058 = vmatpush1.bf16.msra.mxu0 %v2582_v3  ;;  %1099 = vmatpush1.bf16.msra.mxu1 %v2584_v4  ;;  %v3644_v3 = vld [vmem:[#allocation17_spill] sm:$0xff]  ;;  %v3645_v4 = vld [vmem:[#allocation18_spill] sm:$0xff] }
 0x2a6   :  { %1059 = vmatprep.subr.bf16.mxu0 %v2587_v5  ;;  %1100 = vmatprep.subr.bf16.mxu1 %v2591_v6  ;;  %v3646_v5 = vld [vmem:[#allocation19_spill] sm:$0xff]  ;;  %v3647_v6 = vld [vmem:[#allocation20_spill] sm:$0xff] }
 0x2a7   :  { %1089 = vmatprep.mubr.bf16.mxu0 %v3611_v62  ;;  %1130 = vmatprep.mubr.bf16.mxu1 %v3611_v62 }
 0x2a9   :  { %1060 = vmatpush1.bf16.msra.mxu0 %v3639_v23  ;;  %1101 = vmatpush1.bf16.msra.mxu1 %v3640_v12 }
 0x2aa   :  { %1061 = vmatprep.subr.bf16.mxu0 %v3641_v1  ;;  %1102 = vmatprep.subr.bf16.mxu1 %v3642_v2 }
 0x2ad   :  { %1062 = vmatpush1.bf16.msra.mxu0 %v3643_v28  ;;  %1103 = vmatpush1.bf16.msra.mxu1 %v3644_v3 }
 0x2ae   :  { %1063 = vmatprep.subr.bf16.mxu0 %v3645_v4  ;;  %1104 = vmatprep.subr.bf16.mxu1 %v3646_v5 }
 0x2b1   :  { %1064 = vmatpush1.bf16.msra.mxu0 %v3647_v6  ;;  %1105 = vmatpush1.bf16.msra.mxu1 %v3648_v20 }
 0x2b2   :  { %1065 = vmatprep.subr.bf16.mxu0 %v3649_v58  ;;  %1106 = vmatprep.subr.bf16.mxu1 %v3650_v27 }
 0x2b5   :  { %1066 = vmatpush1.bf16.msra.mxu0 %v3651_v25  ;;  %1107 = vmatpush1.bf16.msra.mxu1 %v3652_v22 }
 0x2b6   :  { %1067 = vmatprep.subr.bf16.mxu0 %v3653_v13  ;;  %1108 = vmatprep.subr.bf16.mxu1 %v3654_v19 }
 0x2b9   :  { %1068 = vmatpush1.bf16.msra.mxu0 %v3655_v9  ;;  %1109 = vmatpush1.bf16.msra.mxu1 %v3656_v8 }
 0x2ba   :  { %1069 = vmatprep.subr.bf16.mxu0 %v3657_v17  ;;  %1110 = vmatprep.subr.bf16.mxu1 %v3658_v15 }
 0x2bd   :  { %1070 = vmatpush1.bf16.msra.mxu0 %v3659_v16  ;;  %1111 = vmatpush1.bf16.msra.mxu1 %v3660_v24 }
 0x2be   :  { %1071 = vmatprep.subr.bf16.mxu0 %v3661_v26  ;;  %1112 = vmatprep.subr.bf16.mxu1 %v3662_v29 }
 0x2c1   :  { %1072 = vmatpush1.bf16.msra.mxu0 %v3663_v31  ;;  %1113 = vmatpush1.bf16.msra.mxu1 %v3664_v34 }
 0x2c2   :  { %1139 = vmatprep.subr.bf16.mxu0 %v3665_v21  ;;  %1180 = vmatprep.subr.bf16.mxu1 %v3666_v7 }
 0x344   :  { %v894_v23 = vpop.f32.mrf.mxu0  ;;  %v935_v12 = vpop.f32.mrf.mxu1 }
 0x346   :  { %v896_v1 = vpop.f32.mrf.mxu0  ;;  %v937_v2 = vpop.f32.mrf.mxu1 }
 0x348   :  { %v898_v28 = vpop.f32.mrf.mxu0  ;;  %v939_v3 = vpop.f32.mrf.mxu1 }
 0x34a   :  { %v899_v4 = vpop.f32.mrf.mxu0  ;;  %v940_v5 = vpop.f32.mrf.mxu1 }
 0x364   :  { %v976_v6 = vpop.f32.mrf.mxu0  ;;  %v1017_v20 = vpop.f32.mrf.mxu1 }
 0x365   :  { %v977_v58 = vadd.f32 %v976_v6, %v894_v23  ;;  %v1018_v31 = vadd.f32 %v1017_v20, %v935_v12 }
 0x366   :  { %v978_v27 = vpop.f32.mrf.mxu0  ;;  %v1019_v25 = vpop.f32.mrf.mxu1 }
 0x367   :  { %v1024_v22 = vadd.f32 %v977_v58, %v2812_v30  ;;  %v979_v13 = vadd.f32 %v978_v27, %v896_v1  ;;  %v1020_v26 = vadd.f32 %v1019_v25, %v937_v2  ;;  %v1026_v7 = vadd.f32 %v1018_v31, %v2821_v10 }
 0x368   :  { %v980_v19 = vpop.f32.mrf.mxu0  ;;  %v1021_v9 = vpop.f32.mrf.mxu1 }
 0x369   :  { %v2128_v8 = vmul.f32 -1.442695, %v1024_v22  ;;  %v1025_v17 = vadd.f32 %v979_v13, %v2814_v18  ;;  %v1027_v29 = vadd.f32 %v1020_v26, %v2818_v11  ;;  %v3103_v19 = vld [vmem:[#allocation7] ss:$16 sps:$4 sm:$0xff]   ;;  %v3106_v9 = vld [vmem:[#allocation7 + $0x8] ss:$16 sps:$4 sm:$0xff]  }
 0x36a   :  { %v981_v15 = vpop.f32.mrf.mxu0  ;;  %v1022_v16 = vpop.f32.mrf.mxu1  ;;  %3691 = vst [vmem:[#allocation34_spill] sm:$0xff] %v3103_v19  ;;  %3692 = vst [vmem:[#allocation35_spill] sm:$0xff] %v3106_v9 }
 0x36b   :  { %2283 = vpow2.f32 %v2128_v8  ;;  %v2129_v24 = vmul.f32 -1.442695, %v1025_v17  ;;  %v2130_v34 = vmul.f32 -1.442695, %v1027_v29  ;;  %v3109_v8 = vld [vmem:[#allocation5 + $0xe4] ss:$16 sps:$4 sm:$0xff]  }
 0x36c   :  { %3693 = vst [vmem:[#allocation36_spill] sm:$0xff] %v3109_v8  ;;  %v3112_v17 = vld [vmem:[#allocation5 + $0xec] ss:$16 sps:$4 sm:$0xff]  }
 0x36d   :  { %2285 = vpow2.f32 %v2129_v24  ;;  %3694 = vst [vmem:[#allocation37_spill] sm:$0xff] %v3112_v17 }
 0x36e   :  { %2287 = vpow2.f32 %v2130_v34 }
 0x378   :  { %v2284_v21 = vpop.eup %2283 }
 0x379   :  { %v1031_v23 = vadd.f32 1.0, %v2284_v21 }
 0x37a   :  { %v2286_v1 = vpop.eup %2285 }
 0x37b   :  { %2289 = vrcp.f32 %v1031_v23  ;;  %v1037_v28 = vadd.f32 1.0, %v2286_v1  ;;  %v2288_v3 = vpop.eup %2287 }
 0x37c   :  { %2291 = vtanh.f32 %v1026_v7  ;;  %v1044_v58 = vadd.f32 1.0, %v2288_v3 }
 0x37d   :  { %2293 = vrcp.f32 %v1037_v28 }
 0x37e   :  { %2295 = vrcp.f32 %v1044_v58 }
 0x388   :  { %v2290_v4 = vpop.eup %2289 }
 0x389   :  { %v2292_v5 = vpop.eup %2291 }
 0x38a   :  { %v2294_v6 = vpop.eup %2293  ;;  %v1048_v2 = vmul.f32 %v2292_v5, %v2290_v4 }
 0x38b   :  { %v1047_v27 = vmul.f32 %v2294_v6, %v2900_v14  ;;  %v2296_v20 = vpop.eup %2295  ;;  %v3100_v14 = vld [vmem:[#allocation7 + $0xc] ss:$16 sps:$4 sm:$0xff]  }
 0x38c   :  { %3690 = vst [vmem:[#allocation33_spill] sm:$0xff] %v3100_v14 }
 0x38d   :  { %v2976_v12 = vadd.f32 %v1048_v2, %v1047_v27 }
 0x38f   :  { %2297 = vtanh.f32 %v2976_v12 }
 0x39c   :  { %v2298_v25 = vpop.eup %2297 }
 0x39d   :  { %v1051_v22 = vmul.f32 %v2298_v25, %v2296_v20 }
 0x39f   :  { %v1052_v13 = vpack.c.bf16 %v1051_v22, %v1051_v22 }
 0x3a1   :  { %1054 = vst [vmem:[#allocation8 + $0x8] sm:$0xf] %v1052_v13  ;;  %1090 = vmatmul.mubr.bf16.vlgmr.msra.gmra.mxu0 %v1052_v13  ;;  %1131 = vmatmul.mubr.bf16.vlgmr.msra.gmra.mxu1 %v1052_v13 }
 0x3a2   :  { %1140 = vmatpush1.bf16.msra.mxu0 %v2675_v35  ;;  %1181 = vmatpush1.bf16.msra.mxu1 %v2677_v36  ;;  %v1056_v35 = vld [vmem:[#allocation2 + $0xc] sm:$0xf]  ;;  %v3011_v36 = vld [vmem:[#allocation7 + $0xe4] ss:$16 sps:$4 sm:$0xff]  }
 0x3a3   :  { %1141 = vmatprep.subr.bf16.mxu0 %v2681_v37  ;;  %1182 = vmatprep.subr.bf16.mxu1 %v2685_v38  ;;  %v3014_v37 = vld [vmem:[#allocation7 + $0xec] ss:$16 sps:$4 sm:$0xff]   ;;  %v3017_v38 = vld [vmem:[#allocation7 + $0xe0] ss:$16 sps:$4 sm:$0xff]  }
 0x3a4   :  { %1171 = vmatprep.mubr.bf16.mxu0 %v3611_v62  ;;  %1212 = vmatprep.mubr.bf16.mxu1 %v3611_v62 }
 0x3a6   :  { %1142 = vmatpush1.bf16.msra.mxu0 %v2689_v39  ;;  %1183 = vmatpush1.bf16.msra.mxu1 %v2693_v40  ;;  %v3020_v39 = vld [vmem:[#allocation7 + $0xe8] ss:$16 sps:$4 sm:$0xff]   ;;  %v3026_v40 = vld [vmem:[#allocation7 + $0xcc] ss:$16 sps:$4 sm:$0xff]  }
 0x3a7   :  { %1143 = vmatprep.subr.bf16.mxu0 %v2695_v41  ;;  %1184 = vmatprep.subr.bf16.mxu1 %v2699_v42  ;;  %v3031_v41 = vld [vmem:[#allocation7 + $0xc0] ss:$16 sps:$4 sm:$0xff]   ;;  %v3034_v42 = vld [vmem:[#allocation7 + $0xc8] ss:$16 sps:$4 sm:$0xff]  }
 0x3a8   :  { %3667 = vst [vmem:[#allocation40_spill] sm:$0xff] %v3031_v41  ;;  %3668 = vst [vmem:[#allocation41_spill] sm:$0xff] %v3034_v42 }
 0x3aa   :  { %1144 = vmatpush1.bf16.msra.mxu0 %v2703_v43  ;;  %1185 = vmatpush1.bf16.msra.mxu1 %v2705_v44  ;;  %v3037_v43 = vld [vmem:[#allocation7 + $0xa4] ss:$16 sps:$4 sm:$0xff]   ;;  %v3040_v44 = vld [vmem:[#allocation7 + $0xac] ss:$16 sps:$4 sm:$0xff]  }
 0x3ab   :  { %1145 = vmatprep.subr.bf16.mxu0 %v2709_v45  ;;  %1186 = vmatprep.subr.bf16.mxu1 %v2713_v46  ;;  %3669 = vst [vmem:[#allocation12_spill] sm:$0xff] %v3037_v43  ;;  %3670 = vst [vmem:[#allocation13_spill] sm:$0xff] %v3040_v44  ;;  %v3043_v45 = vld [vmem:[#allocation7 + $0xa0] ss:$16 sps:$4 sm:$0xff]   ;;  %v3046_v46 = vld [vmem:[#allocation7 + $0xa8] ss:$16 sps:$4 sm:$0xff]  }
 0x3ac   :  { %3671 = vst [vmem:[#allocation14_spill] sm:$0xff] %v3043_v45  ;;  %3672 = vst [vmem:[#allocation15_spill] sm:$0xff] %v3046_v46 }
 0x3ae   :  { %1146 = vmatpush1.bf16.msra.mxu0 %v2717_v47  ;;  %1187 = vmatpush1.bf16.msra.mxu1 %v2719_v48  ;;  %v3049_v47 = vld [vmem:[#allocation7 + $0x84] ss:$16 sps:$4 sm:$0xff]   ;;  %v3052_v48 = vld [vmem:[#allocation7 + $0x8c] ss:$16 sps:$4 sm:$0xff]  }
 0x3af   :  { %1147 = vmatprep.subr.bf16.mxu0 %v2723_v49  ;;  %1188 = vmatprep.subr.bf16.mxu1 %v2725_v50  ;;  %3673 = vst [vmem:[#allocation16_spill] sm:$0xff] %v3049_v47  ;;  %3674 = vst [vmem:[#allocation17_spill] sm:$0xff] %v3052_v48  ;;  %v3055_v49 = vld [vmem:[#allocation7 + $0x80] ss:$16 sps:$4 sm:$0xff]   ;;  %v3058_v50 = vld [vmem:[#allocation7 + $0x88] ss:$16 sps:$4 sm:$0xff]  }
 0x3b0   :  { %3675 = vst [vmem:[#allocation18_spill] sm:$0xff] %v3055_v49  ;;  %3676 = vst [vmem:[#allocation19_spill] sm:$0xff] %v3058_v50 }
 0x3b2   :  { %1148 = vmatpush1.bf16.msra.mxu0 %v2729_v51  ;;  %1189 = vmatpush1.bf16.msra.mxu1 %v2731_v52  ;;  %v3061_v51 = vld [vmem:[#allocation7 + $0x64] ss:$16 sps:$4 sm:$0xff]   ;;  %v3064_v52 = vld [vmem:[#allocation7 + $0x6c] ss:$16 sps:$4 sm:$0xff]  }
 0x3b3   :  { %1149 = vmatprep.subr.bf16.mxu0 %v2735_v53  ;;  %1190 = vmatprep.subr.bf16.mxu1 %v2737_v54  ;;  %3677 = vst [vmem:[#allocation20_spill] sm:$0xff] %v3061_v51  ;;  %3678 = vst [vmem:[#allocation21_spill] sm:$0xff] %v3064_v52  ;;  %v3067_v53 = vld [vmem:[#allocation7 + $0x60] ss:$16 sps:$4 sm:$0xff]   ;;  %v3070_v54 = vld [vmem:[#allocation7 + $0x68] ss:$16 sps:$4 sm:$0xff]  }
 0x3b4   :  { %3679 = vst [vmem:[#allocation22_spill] sm:$0xff] %v3067_v53  ;;  %3680 = vst [vmem:[#allocation23_spill] sm:$0xff] %v3070_v54 }
 0x3b6   :  { %1150 = vmatpush1.bf16.msra.mxu0 %v2741_v55  ;;  %1191 = vmatpush1.bf16.msra.mxu1 %v2743_v56  ;;  %v3073_v55 = vld [vmem:[#allocation7 + $0x44] ss:$16 sps:$4 sm:$0xff]   ;;  %v3076_v56 = vld [vmem:[#allocation7 + $0x4c] ss:$16 sps:$4 sm:$0xff]  }
 0x3b7   :  { %1151 = vmatprep.subr.bf16.mxu0 %v2747_v57  ;;  %1192 = vmatprep.subr.bf16.mxu1 %v3612_v32  ;;  %3681 = vst [vmem:[#allocation24_spill] sm:$0xff] %v3073_v55  ;;  %3682 = vst [vmem:[#allocation25_spill] sm:$0xff] %v3076_v56  ;;  %v3079_v57 = vld [vmem:[#allocation7 + $0x40] ss:$16 sps:$4 sm:$0xff]   ;;  %v3094_v32 = vld [vmem:[#allocation7 + $0x28] ss:$16 sps:$4 sm:$0xff]  }
 0x3b8   :  { %3683 = vst [vmem:[#allocation26_spill] sm:$0xff] %v3079_v57  ;;  %3688 = vst [vmem:[#allocation31_spill] sm:$0xff] %v3094_v32 }
 0x3ba   :  { %1152 = vmatpush1.bf16.msra.mxu0 %v2753_v59  ;;  %1193 = vmatpush1.bf16.msra.mxu1 %v2755_v60  ;;  %v3082_v59 = vld [vmem:[#allocation7 + $0x48] ss:$16 sps:$4 sm:$0xff]   ;;  %v3085_v60 = vld [vmem:[#allocation7 + $0x24] ss:$16 sps:$4 sm:$0xff]  }
 0x3bb   :  { %1153 = vmatprep.subr.bf16.mxu0 %v2759_v61  ;;  %1194 = vmatprep.subr.bf16.mxu1 %v3613_v33  ;;  %3684 = vst [vmem:[#allocation27_spill] sm:$0xff] %v3082_v59  ;;  %3685 = vst [vmem:[#allocation28_spill] sm:$0xff] %v3085_v60  ;;  %v3088_v61 = vld [vmem:[#allocation7 + $0x2c] ss:$16 sps:$4 sm:$0xff]   ;;  %v3097_v33 = vld [vmem:[#allocation7 + $0x4] ss:$16 sps:$4 sm:$0xff]  }
 0x3bc   :  { %3686 = vst [vmem:[#allocation29_spill] sm:$0xff] %v3088_v61  ;;  %3689 = vst [vmem:[#allocation32_spill] sm:$0xff] %v3097_v33 }
 0x3be   :  { %1154 = vmatpush1.bf16.msra.mxu0 %v2765_v63  ;;  %1195 = vmatpush1.bf16.msra.mxu1 %v2767_v0  ;;  %v3023_v0 = vld [vmem:[#allocation7 + $0xc4] ss:$16 sps:$4 sm:$0xff]   ;;  %v3091_v63 = vld [vmem:[#allocation7 + $0x20] ss:$16 sps:$4 sm:$0xff]  }
 0x3bf   :  { %1254 = vmatprep.subr.bf16.mxu0 %v3011_v36  ;;  %1295 = vmatprep.subr.bf16.mxu1 %v3014_v37  ;;  %3687 = vst [vmem:[#allocation30_spill] sm:$0xff] %v3091_v63 }
 0x3c1   :  { %1172 = vmatmul.mubr.bf16.vlgmr.msra.gmra.mxu0 %v1056_v35  ;;  %1213 = vmatmul.mubr.bf16.vlgmr.msra.gmra.mxu1 %v1056_v35 }
 0x3c2   :  { %1255 = vmatpush1.bf16.msra.mxu0 %v3017_v38  ;;  %1296 = vmatpush1.bf16.msra.mxu1 %v3020_v39 }
 0x3c3   :  { %1256 = vmatprep.subr.bf16.mxu0 %v3023_v0  ;;  %1297 = vmatprep.subr.bf16.mxu1 %v3026_v40 }
 0x3c4   :  { %1286 = vmatprep.mubr.bf16.mxu0 %v3611_v62  ;;  %1327 = vmatprep.mubr.bf16.mxu1 %v3611_v62 }
 0x3c6   :  { %1257 = vmatpush1.bf16.msra.mxu0 %v3031_v41  ;;  %1298 = vmatpush1.bf16.msra.mxu1 %v3034_v42 }
 0x3c7   :  { %1258 = vmatprep.subr.bf16.mxu0 %v3037_v43  ;;  %1299 = vmatprep.subr.bf16.mxu1 %v3040_v44 }
 0x3ca   :  { %1259 = vmatpush1.bf16.msra.mxu0 %v3043_v45  ;;  %1300 = vmatpush1.bf16.msra.mxu1 %v3046_v46 }
 0x3cb   :  { %1260 = vmatprep.subr.bf16.mxu0 %v3049_v47  ;;  %1301 = vmatprep.subr.bf16.mxu1 %v3052_v48 }
 0x3ce   :  { %1261 = vmatpush1.bf16.msra.mxu0 %v3055_v49  ;;  %1302 = vmatpush1.bf16.msra.mxu1 %v3058_v50 }
 0x3cf   :  { %1262 = vmatprep.subr.bf16.mxu0 %v3061_v51  ;;  %1303 = vmatprep.subr.bf16.mxu1 %v3064_v52 }
 0x3d2   :  { %1263 = vmatpush1.bf16.msra.mxu0 %v3067_v53  ;;  %1304 = vmatpush1.bf16.msra.mxu1 %v3070_v54 }
 0x3d3   :  { %1264 = vmatprep.subr.bf16.mxu0 %v3073_v55  ;;  %1305 = vmatprep.subr.bf16.mxu1 %v3076_v56 }
 0x3d6   :  { %1265 = vmatpush1.bf16.msra.mxu0 %v3079_v57  ;;  %1306 = vmatpush1.bf16.msra.mxu1 %v3082_v59 }
 0x3d7   :  { %1266 = vmatprep.subr.bf16.mxu0 %v3085_v60  ;;  %1307 = vmatprep.subr.bf16.mxu1 %v3088_v61 }
 0x3da   :  { %1267 = vmatpush1.bf16.msra.mxu0 %v3091_v63  ;;  %1308 = vmatpush1.bf16.msra.mxu1 %v3094_v32 }
 0x3db   :  { %1268 = vmatprep.subr.bf16.mxu0 %v3097_v33  ;;  %1309 = vmatprep.subr.bf16.mxu1 %v3100_v14 }
 0x3de   :  { %1269 = vmatpush1.bf16.msra.mxu0 %v3103_v19  ;;  %1310 = vmatpush1.bf16.msra.mxu1 %v3106_v9 }
 0x3df   :  { %1336 = vmatprep.subr.bf16.mxu0 %v3109_v8  ;;  %1377 = vmatprep.subr.bf16.mxu1 %v3112_v17 }
 0x461   :  { %v1091_v15 = vpop.f32.mrf.mxu0  ;;  %v1132_v16 = vpop.f32.mrf.mxu1 }
 0x463   :  { %v1093_v24 = vpop.f32.mrf.mxu0  ;;  %v1134_v26 = vpop.f32.mrf.mxu1 }
 0x465   :  { %v1095_v29 = vpop.f32.mrf.mxu0  ;;  %v1136_v31 = vpop.f32.mrf.mxu1 }
 0x467   :  { %v1096_v34 = vpop.f32.mrf.mxu0  ;;  %v1137_v21 = vpop.f32.mrf.mxu1 }
 0x481   :  { %v1173_v7 = vpop.f32.mrf.mxu0  ;;  %v1214_v23 = vpop.f32.mrf.mxu1 }
 0x482   :  { %v1174_v1 = vadd.f32 %v1173_v7, %v1091_v15  ;;  %v1215_v29 = vadd.f32 %v1214_v23, %v1132_v16 }
 0x483   :  { %v1175_v28 = vpop.f32.mrf.mxu0  ;;  %v1216_v3 = vpop.f32.mrf.mxu1 }
 0x484   :  { %v1221_v4 = vadd.f32 %v1174_v1, %v2812_v30  ;;  %v1176_v5 = vadd.f32 %v1175_v28, %v1093_v24  ;;  %v1217_v13 = vadd.f32 %v1216_v3, %v1134_v26  ;;  %v1223_v34 = vadd.f32 %v1215_v29, %v2821_v10  ;;  %v3143_v29 = vld [vmem:[#allocation5 + $0xa4] ss:$16 sps:$4 sm:$0xff]  }
 0x485   :  { %v1177_v6 = vpop.f32.mrf.mxu0  ;;  %v1218_v58 = vpop.f32.mrf.mxu1 }
 0x486   :  { %v2131_v2 = vmul.f32 -1.442695, %v1221_v4  ;;  %v1222_v27 = vadd.f32 %v1176_v5, %v2814_v18  ;;  %v1224_v35 = vadd.f32 %v1217_v13, %v2818_v11  ;;  %v3137_v13 = vld [vmem:[#allocation5 + $0xc0] ss:$16 sps:$4 sm:$0xff]  }
 0x487   :  { %v1178_v20 = vpop.f32.mrf.mxu0  ;;  %v1219_v25 = vpop.f32.mrf.mxu1 }
 0x488   :  { %2299 = vpow2.f32 %v2131_v2  ;;  %v2132_v22 = vmul.f32 -1.442695, %v1222_v27  ;;  %v2133_v15 = vmul.f32 -1.442695, %v1224_v35  ;;  %v3123_v20 = vld [vmem:[#allocation5 + $0xe0] ss:$16 sps:$4 sm:$0xff]  }
 0x489   :  { %v3126_v25 = vld [vmem:[#allocation5 + $0xe8] ss:$16 sps:$4 sm:$0xff]  }
 0x48a   :  { %2301 = vpow2.f32 %v2132_v22  ;;  %v3132_v22 = vld [vmem:[#allocation5 + $0xcc] ss:$16 sps:$4 sm:$0xff]   ;;  %v3140_v35 = vld [vmem:[#allocation5 + $0xc8] ss:$16 sps:$4 sm:$0xff]  }
 0x48b   :  { %2303 = vpow2.f32 %v2133_v15  ;;  %v3146_v15 = vld [vmem:[#allocation5 + $0xac] ss:$16 sps:$4 sm:$0xff]  }
 0x495   :  { %v2300_v31 = vpop.eup %2299 }
 0x496   :  { %v1228_v21 = vadd.f32 1.0, %v2300_v31  ;;  %v3149_v31 = vld [vmem:[#allocation5 + $0xa0] ss:$16 sps:$4 sm:$0xff]  }
 0x497   :  { %v2302_v24 = vpop.eup %2301 }
 0x498   :  { %2305 = vrcp.f32 %v1228_v21  ;;  %v1234_v7 = vadd.f32 1.0, %v2302_v24  ;;  %v2304_v1 = vpop.eup %2303  ;;  %v3155_v21 = vld [vmem:[#allocation5 + $0x84] ss:$16 sps:$4 sm:$0xff]   ;;  %v3158_v24 = vld [vmem:[#allocation5 + $0x8c] ss:$16 sps:$4 sm:$0xff]  }
 0x499   :  { %2307 = vtanh.f32 %v1223_v34  ;;  %v1241_v6 = vadd.f32 1.0, %v2304_v1  ;;  %v3152_v34 = vld [vmem:[#allocation5 + $0xa8] ss:$16 sps:$4 sm:$0xff]  }
 0x49a   :  { %2309 = vrcp.f32 %v1234_v7  ;;  %v3161_v7 = vld [vmem:[#allocation5 + $0x80] ss:$16 sps:$4 sm:$0xff]   ;;  %v3164_v1 = vld [vmem:[#allocation5 + $0x88] ss:$16 sps:$4 sm:$0xff]  }
 0x49b   :  { %2311 = vrcp.f32 %v1241_v6  ;;  %v3176_v6 = vld [vmem:[#allocation5 + $0x68] ss:$16 sps:$4 sm:$0xff]  }
 0x4a5   :  { %v2306_v28 = vpop.eup %2305 }
 0x4a6   :  { %v2308_v4 = vpop.eup %2307 }
 0x4a7   :  { %v2310_v5 = vpop.eup %2309  ;;  %v1245_v26 = vmul.f32 %v2308_v4, %v2306_v28  ;;  %v3167_v28 = vld [vmem:[#allocation5 + $0x64] ss:$16 sps:$4 sm:$0xff]   ;;  %v3170_v4 = vld [vmem:[#allocation5 + $0x6c] ss:$16 sps:$4 sm:$0xff]  }
 0x4a8   :  { %v1244_v3 = vmul.f32 %v2310_v5, %v2976_v12  ;;  %v2312_v23 = vpop.eup %2311  ;;  %v3129_v12 = vld [vmem:[#allocation5 + $0xc4] ss:$16 sps:$4 sm:$0xff]   ;;  %v3173_v5 = vld [vmem:[#allocation5 + $0x60] ss:$16 sps:$4 sm:$0xff]  }
 0x4aa   :  { %v3120_v16 = vadd.f32 %v1245_v26, %v1244_v3  ;;  %v3179_v26 = vld [vmem:[#allocation5 + $0x44] ss:$16 sps:$4 sm:$0xff]   ;;  %v3182_v3 = vld [vmem:[#allocation5 + $0x4c] ss:$16 sps:$4 sm:$0xff]  }
 0x4ab   :  { %3695 = vst [vmem:[#allocation38_spill] sm:$0xff] %v3179_v26  ;;  %3696 = vst [vmem:[#allocation39_spill] sm:$0xff] %v3182_v3 }
 0x4ac   :  { %2313 = vtanh.f32 %v3120_v16 }
 0x4b9   :  { %v2314_v58 = vpop.eup %2313 }
 0x4ba   :  { %v1248_v2 = vmul.f32 %v2314_v58, %v2312_v23  ;;  %v3185_v23 = vld [vmem:[#allocation5 + $0x40] ss:$16 sps:$4 sm:$0xff]   ;;  %v3188_v58 = vld [vmem:[#allocation5 + $0x48] ss:$16 sps:$4 sm:$0xff]  }
 0x4bb   :  { %3697 = vst [vmem:[#allocation42_spill] sm:$0xff] %v3185_v23  ;;  %3698 = vst [vmem:[#allocation43_spill] sm:$0xff] %v3188_v58 }
 0x4bc   :  { %v1249_v27 = vpack.c.bf16 %v1248_v2, %v1248_v2  ;;  %v3191_v2 = vld [vmem:[#allocation5 + $0x24] ss:$16 sps:$4 sm:$0xff]  }
 0x4bd   :  { %3699 = vst [vmem:[#allocation44_spill] sm:$0xff] %v3191_v2 }
 0x4be   :  { %1251 = vst [vmem:[#allocation8 + $0xc] sm:$0xf] %v1249_v27  ;;  %1287 = vmatmul.mubr.bf16.vlgmr.msra.gmra.mxu0 %v1249_v27  ;;  %1328 = vmatmul.mubr.bf16.vlgmr.msra.gmra.mxu1 %v1249_v27  ;;  %v3194_v27 = vld [vmem:[#allocation5 + $0x2c] ss:$16 sps:$4 sm:$0xff]  }
 0x4bf   :  { %1337 = vmatpush1.bf16.msra.mxu0 %v3123_v20  ;;  %1378 = vmatpush1.bf16.msra.mxu1 %v3126_v25  ;;  %3700 = vst [vmem:[#allocation45_spill] sm:$0xff] %v3194_v27 }
 0x4c0   :  { %1338 = vmatprep.subr.bf16.mxu0 %v3129_v12  ;;  %1379 = vmatprep.subr.bf16.mxu1 %v3132_v22 }
 0x4c1   :  { %1368 = vmatprep.mubr.bf16.mxu0 %v3611_v62  ;;  %1409 = vmatprep.mubr.bf16.mxu1 %v3611_v62 }
 0x4c3   :  { %1339 = vmatpush1.bf16.msra.mxu0 %v3137_v13  ;;  %1380 = vmatpush1.bf16.msra.mxu1 %v3140_v35 }
 0x4c4   :  { %1340 = vmatprep.subr.bf16.mxu0 %v3143_v29  ;;  %1381 = vmatprep.subr.bf16.mxu1 %v3146_v15 }
 0x4c7   :  { %1341 = vmatpush1.bf16.msra.mxu0 %v3149_v31  ;;  %1382 = vmatpush1.bf16.msra.mxu1 %v3152_v34 }
 0x4c8   :  { %1342 = vmatprep.subr.bf16.mxu0 %v3155_v21  ;;  %1383 = vmatprep.subr.bf16.mxu1 %v3158_v24 }
 0x4cb   :  { %1343 = vmatpush1.bf16.msra.mxu0 %v3161_v7  ;;  %1384 = vmatpush1.bf16.msra.mxu1 %v3164_v1 }
 0x4cc   :  { %1344 = vmatprep.subr.bf16.mxu0 %v3167_v28  ;;  %1385 = vmatprep.subr.bf16.mxu1 %v3170_v4 }
 0x4cf   :  { %1345 = vmatpush1.bf16.msra.mxu0 %v3173_v5  ;;  %1386 = vmatpush1.bf16.msra.mxu1 %v3176_v6 }
 0x4d0   :  { %1346 = vmatprep.subr.bf16.mxu0 %v3179_v26  ;;  %1387 = vmatprep.subr.bf16.mxu1 %v3182_v3  ;;  %v3197_v26 = vld [vmem:[#allocation5 + $0x20] ss:$16 sps:$4 sm:$0xff]   ;;  %v3200_v3 = vld [vmem:[#allocation5 + $0x28] ss:$16 sps:$4 sm:$0xff]  }
 0x4d1   :  { %3701 = vst [vmem:[#allocation46_spill] sm:$0xff] %v3197_v26 }
 0x4d3   :  { %1347 = vmatpush1.bf16.msra.mxu0 %v3185_v23  ;;  %1388 = vmatpush1.bf16.msra.mxu1 %v3188_v58  ;;  %v3203_v23 = vld [vmem:[#allocation5 + $0x4] ss:$16 sps:$4 sm:$0xff]   ;;  %v3206_v58 = vld [vmem:[#allocation5 + $0xc] ss:$16 sps:$4 sm:$0xff]  }
 0x4d4   :  { %1348 = vmatprep.subr.bf16.mxu0 %v3191_v2  ;;  %1389 = vmatprep.subr.bf16.mxu1 %v3194_v27  ;;  %v3209_v2 = vld [vmem:[#allocation5] ss:$16 sps:$4 sm:$0xff]   ;;  %v3212_v27 = vld [vmem:[#allocation5 + $0x8] ss:$16 sps:$4 sm:$0xff]  }
 0x4d7   :  { %1349 = vmatpush1.bf16.msra.mxu0 %v3197_v26  ;;  %1390 = vmatpush1.bf16.msra.mxu1 %v3200_v3  ;;  %v1253_v26 = vld [vmem:[#allocation2 + $0x10] sm:$0xf] }
 0x4d8   :  { %1350 = vmatprep.subr.bf16.mxu0 %v3203_v23  ;;  %1391 = vmatprep.subr.bf16.mxu1 %v3206_v58 }
 0x4db   :  { %1351 = vmatpush1.bf16.msra.mxu0 %v3209_v2  ;;  %1392 = vmatpush1.bf16.msra.mxu1 %v3212_v27 }
 0x4dc   :  { %1451 = vmatprep.subr.bf16.mxu0 %v3011_v36  ;;  %1492 = vmatprep.subr.bf16.mxu1 %v3014_v37 }
 0x4de   :  { %1369 = vmatmul.mubr.bf16.vlgmr.msra.gmra.mxu0 %v1253_v26  ;;  %1410 = vmatmul.mubr.bf16.vlgmr.msra.gmra.mxu1 %v1253_v26 }
 0x4df   :  { %1452 = vmatpush1.bf16.msra.mxu0 %v3017_v38  ;;  %1493 = vmatpush1.bf16.msra.mxu1 %v3020_v39 }
 0x4e0   :  { %1453 = vmatprep.subr.bf16.mxu0 %v3023_v0  ;;  %1494 = vmatprep.subr.bf16.mxu1 %v3026_v40 }
 0x4e1   :  { %1483 = vmatprep.mubr.bf16.mxu0 %v3611_v62  ;;  %1524 = vmatprep.mubr.bf16.mxu1 %v3611_v62 }
 0x4e3   :  { %1454 = vmatpush1.bf16.msra.mxu0 %v3031_v41  ;;  %1495 = vmatpush1.bf16.msra.mxu1 %v3034_v42 }
 0x4e4   :  { %1455 = vmatprep.subr.bf16.mxu0 %v3037_v43  ;;  %1496 = vmatprep.subr.bf16.mxu1 %v3040_v44 }
 0x4e7   :  { %1456 = vmatpush1.bf16.msra.mxu0 %v3043_v45  ;;  %1497 = vmatpush1.bf16.msra.mxu1 %v3046_v46 }
 0x4e8   :  { %1457 = vmatprep.subr.bf16.mxu0 %v3049_v47  ;;  %1498 = vmatprep.subr.bf16.mxu1 %v3052_v48 }
 0x4eb   :  { %1458 = vmatpush1.bf16.msra.mxu0 %v3055_v49  ;;  %1499 = vmatpush1.bf16.msra.mxu1 %v3058_v50 }
 0x4ec   :  { %1459 = vmatprep.subr.bf16.mxu0 %v3061_v51  ;;  %1500 = vmatprep.subr.bf16.mxu1 %v3064_v52 }
 0x4ef   :  { %1460 = vmatpush1.bf16.msra.mxu0 %v3067_v53  ;;  %1501 = vmatpush1.bf16.msra.mxu1 %v3070_v54 }
 0x4f0   :  { %1461 = vmatprep.subr.bf16.mxu0 %v3073_v55  ;;  %1502 = vmatprep.subr.bf16.mxu1 %v3076_v56 }
 0x4f3   :  { %1462 = vmatpush1.bf16.msra.mxu0 %v3079_v57  ;;  %1503 = vmatpush1.bf16.msra.mxu1 %v3082_v59 }
 0x4f4   :  { %1463 = vmatprep.subr.bf16.mxu0 %v3085_v60  ;;  %1504 = vmatprep.subr.bf16.mxu1 %v3088_v61 }
 0x4f7   :  { %1464 = vmatpush1.bf16.msra.mxu0 %v3091_v63  ;;  %1505 = vmatpush1.bf16.msra.mxu1 %v3094_v32 }
 0x4f8   :  { %1465 = vmatprep.subr.bf16.mxu0 %v3097_v33  ;;  %1506 = vmatprep.subr.bf16.mxu1 %v3100_v14 }
 0x4fb   :  { %1466 = vmatpush1.bf16.msra.mxu0 %v3103_v19  ;;  %1507 = vmatpush1.bf16.msra.mxu1 %v3106_v9 }
 0x4fc   :  { %1533 = vmatprep.subr.bf16.mxu0 %v3109_v8  ;;  %1574 = vmatprep.subr.bf16.mxu1 %v3112_v17 }
 0x57e   :  { %v1288_v26 = vpop.f32.mrf.mxu0  ;;  %v1329_v60 = vpop.f32.mrf.mxu1 }
 0x580   :  { %v1290_v59 = vpop.f32.mrf.mxu0  ;;  %v1331_v61 = vpop.f32.mrf.mxu1 }
 0x582   :  { %v1292_v57 = vpop.f32.mrf.mxu0  ;;  %v1333_v63 = vpop.f32.mrf.mxu1 }
 0x584   :  { %v1293_v56 = vpop.f32.mrf.mxu0  ;;  %v1334_v32 = vpop.f32.mrf.mxu1 }
 0x59e   :  { %v1370_v55 = vpop.f32.mrf.mxu0  ;;  %v1411_v33 = vpop.f32.mrf.mxu1 }
 0x59f   :  { %v1371_v54 = vadd.f32 %v1370_v55, %v1288_v26  ;;  %v1412_v32 = vadd.f32 %v1411_v33, %v1329_v60 }
 0x5a0   :  { %v1372_v14 = vpop.f32.mrf.mxu0  ;;  %v1413_v53 = vpop.f32.mrf.mxu1 }
 0x5a1   :  { %v1418_v19 = vadd.f32 %v1371_v54, %v2812_v30  ;;  %v1373_v9 = vadd.f32 %v1372_v14, %v1290_v59  ;;  %v1414_v56 = vadd.f32 %v1413_v53, %v1331_v61  ;;  %v1420_v48 = vadd.f32 %v1412_v32, %v2821_v10  ;;  %v3707_v32 = vld [vmem:[#allocation45_spill] sm:$0xff] }
 0x5a2   :  { %v1374_v52 = vpop.f32.mrf.mxu0  ;;  %v1415_v8 = vpop.f32.mrf.mxu1 }
 0x5a3   :  { %v2134_v51 = vmul.f32 -1.442695, %v1418_v19  ;;  %v1419_v17 = vadd.f32 %v1373_v9, %v2814_v18  ;;  %v1421_v63 = vadd.f32 %v1414_v56, %v2818_v11  ;;  %v3705_v56 = vld [vmem:[#allocation43_spill] sm:$0xff] }
 0x5a4   :  { %v1375_v50 = vpop.f32.mrf.mxu0  ;;  %v1416_v49 = vpop.f32.mrf.mxu1 }
 0x5a5   :  { %2315 = vpow2.f32 %v2134_v51  ;;  %v2135_v57 = vmul.f32 -1.442695, %v1419_v17  ;;  %v2136_v55 = vmul.f32 -1.442695, %v1421_v63  ;;  %v3706_v63 = vld [vmem:[#allocation44_spill] sm:$0xff] }
 0x5a7   :  { %2317 = vpow2.f32 %v2135_v57  ;;  %v3704_v57 = vld [vmem:[#allocation42_spill] sm:$0xff] }
 0x5a8   :  { %2319 = vpow2.f32 %v2136_v55  ;;  %v3708_v55 = vld [vmem:[#allocation46_spill] sm:$0xff] }
 0x5b2   :  { %v2316_v26 = vpop.eup %2315 }
 0x5b3   :  { %v1425_v54 = vadd.f32 1.0, %v2316_v26  ;;  %v1450_v26 = vld [vmem:[#allocation2 + $0x14] sm:$0xf] }
 0x5b4   :  { %v2318_v59 = vpop.eup %2317 }
 0x5b5   :  { %2321 = vrcp.f32 %v1425_v54  ;;  %v1431_v52 = vadd.f32 1.0, %v2318_v59  ;;  %v2320_v50 = vpop.eup %2319  ;;  %v3709_v54 = vld [vmem:[#allocation17_spill] sm:$0xff]  ;;  %v3710_v59 = vld [vmem:[#allocation18_spill] sm:$0xff] }
 0x5b6   :  { %2323 = vtanh.f32 %v1420_v48  ;;  %v1438_v19 = vadd.f32 1.0, %v2320_v50  ;;  %v3702_v48 = vld [vmem:[#allocation38_spill] sm:$0xff]  ;;  %v3712_v50 = vld [vmem:[#allocation20_spill] sm:$0xff] }
 0x5b7   :  { %2325 = vrcp.f32 %v1431_v52  ;;  %v3711_v52 = vld [vmem:[#allocation19_spill] sm:$0xff] }
 0x5b8   :  { %2327 = vrcp.f32 %v1438_v19  ;;  %v3716_v19 = vld [vmem:[#allocation24_spill] sm:$0xff] }
 0x5c2   :  { %v2322_v49 = vpop.eup %2321 }
 0x5c3   :  { %v2324_v51 = vpop.eup %2323 }
 0x5c4   :  { %v2326_v14 = vpop.eup %2325  ;;  %v1442_v53 = vmul.f32 %v2324_v51, %v2322_v49  ;;  %v3713_v49 = vld [vmem:[#allocation21_spill] sm:$0xff]  ;;  %v3714_v51 = vld [vmem:[#allocation22_spill] sm:$0xff] }
 0x5c5   :  { %v1441_v61 = vmul.f32 %v2326_v14, %v3120_v16  ;;  %v2328_v33 = vpop.eup %2327  ;;  %v3703_v16 = vld [vmem:[#allocation39_spill] sm:$0xff] }
 0x5c6   :  { %v3715_v14 = vld [vmem:[#allocation23_spill] sm:$0xff] }
 0x5c7   :  { %v3256_v60 = vadd.f32 %v1442_v53, %v1441_v61  ;;  %v3717_v53 = vld [vmem:[#allocation25_spill] sm:$0xff]  ;;  %v3718_v61 = vld [vmem:[#allocation26_spill] sm:$0xff] }
 0x5c9   :  { %2329 = vtanh.f32 %v3256_v60 }
 0x5d6   :  { %v2330_v9 = vpop.eup %2329 }
 0x5d7   :  { %v1445_v8 = vmul.f32 %v2330_v9, %v2328_v33  ;;  %v3719_v33 = vld [vmem:[#allocation27_spill] sm:$0xff]  ;;  %v3720_v9 = vld [vmem:[#allocation28_spill] sm:$0xff] }
 0x5d9   :  { %v1446_v17 = vpack.c.bf16 %v1445_v8, %v1445_v8  ;;  %v3721_v8 = vld [vmem:[#allocation29_spill] sm:$0xff] }
 0x5db   :  { %1448 = vst [vmem:[#allocation8 + $0x10] sm:$0xf] %v1446_v17  ;;  %1484 = vmatmul.mubr.bf16.vlgmr.msra.gmra.mxu0 %v1446_v17  ;;  %1525 = vmatmul.mubr.bf16.vlgmr.msra.gmra.mxu1 %v1446_v17  ;;  %v3722_v17 = vld [vmem:[#allocation30_spill] sm:$0xff] }
 0x5dc   :  { %1534 = vmatpush1.bf16.msra.mxu0 %v3123_v20  ;;  %1575 = vmatpush1.bf16.msra.mxu1 %v3126_v25 }
 0x5dd   :  { %1535 = vmatprep.subr.bf16.mxu0 %v3129_v12  ;;  %1576 = vmatprep.subr.bf16.mxu1 %v3132_v22 }
 0x5de   :  { %1565 = vmatprep.mubr.bf16.mxu0 %v3611_v62  ;;  %1606 = vmatprep.mubr.bf16.mxu1 %v3611_v62 }
 0x5e0   :  { %1536 = vmatpush1.bf16.msra.mxu0 %v3137_v13  ;;  %1577 = vmatpush1.bf16.msra.mxu1 %v3140_v35 }
 0x5e1   :  { %1537 = vmatprep.subr.bf16.mxu0 %v3143_v29  ;;  %1578 = vmatprep.subr.bf16.mxu1 %v3146_v15 }
 0x5e4   :  { %1538 = vmatpush1.bf16.msra.mxu0 %v3149_v31  ;;  %1579 = vmatpush1.bf16.msra.mxu1 %v3152_v34 }
 0x5e5   :  { %1539 = vmatprep.subr.bf16.mxu0 %v3155_v21  ;;  %1580 = vmatprep.subr.bf16.mxu1 %v3158_v24 }
 0x5e8   :  { %1540 = vmatpush1.bf16.msra.mxu0 %v3161_v7  ;;  %1581 = vmatpush1.bf16.msra.mxu1 %v3164_v1 }
 0x5e9   :  { %1541 = vmatprep.subr.bf16.mxu0 %v3167_v28  ;;  %1582 = vmatprep.subr.bf16.mxu1 %v3170_v4 }
 0x5ec   :  { %1542 = vmatpush1.bf16.msra.mxu0 %v3173_v5  ;;  %1583 = vmatpush1.bf16.msra.mxu1 %v3176_v6 }
 0x5ed   :  { %1543 = vmatprep.subr.bf16.mxu0 %v3702_v48  ;;  %1584 = vmatprep.subr.bf16.mxu1 %v3703_v16 }
 0x5f0   :  { %1544 = vmatpush1.bf16.msra.mxu0 %v3704_v57  ;;  %1585 = vmatpush1.bf16.msra.mxu1 %v3705_v56 }
 0x5f1   :  { %1545 = vmatprep.subr.bf16.mxu0 %v3706_v63  ;;  %1586 = vmatprep.subr.bf16.mxu1 %v3707_v32 }
 0x5f4   :  { %1546 = vmatpush1.bf16.msra.mxu0 %v3708_v55  ;;  %1587 = vmatpush1.bf16.msra.mxu1 %v3200_v3 }
 0x5f5   :  { %1547 = vmatprep.subr.bf16.mxu0 %v3203_v23  ;;  %1588 = vmatprep.subr.bf16.mxu1 %v3206_v58 }
 0x5f8   :  { %1548 = vmatpush1.bf16.msra.mxu0 %v3209_v2  ;;  %1589 = vmatpush1.bf16.msra.mxu1 %v3212_v27 }
 0x5f9   :  { %1648 = vmatprep.subr.bf16.mxu0 %v3011_v36  ;;  %1689 = vmatprep.subr.bf16.mxu1 %v3014_v37 }
 0x5fb   :  { %1566 = vmatmul.mubr.bf16.vlgmr.msra.gmra.mxu0 %v1450_v26  ;;  %1607 = vmatmul.mubr.bf16.vlgmr.msra.gmra.mxu1 %v1450_v26  ;;  %v3723_v26 = vld [vmem:[#allocation31_spill] sm:$0xff] }
 0x5fc   :  { %1649 = vmatpush1.bf16.msra.mxu0 %v3017_v38  ;;  %1690 = vmatpush1.bf16.msra.mxu1 %v3020_v39 }
 0x5fd   :  { %1650 = vmatprep.subr.bf16.mxu0 %v3023_v0  ;;  %1691 = vmatprep.subr.bf16.mxu1 %v3026_v40 }
 0x5fe   :  { %1680 = vmatprep.mubr.bf16.mxu0 %v3611_v62  ;;  %1721 = vmatprep.mubr.bf16.mxu1 %v3611_v62 }
 0x600   :  { %1651 = vmatpush1.bf16.msra.mxu0 %v3031_v41  ;;  %1692 = vmatpush1.bf16.msra.mxu1 %v3034_v42 }
 0x601   :  { %1652 = vmatprep.subr.bf16.mxu0 %v3037_v43  ;;  %1693 = vmatprep.subr.bf16.mxu1 %v3040_v44 }
 0x604   :  { %1653 = vmatpush1.bf16.msra.mxu0 %v3043_v45  ;;  %1694 = vmatpush1.bf16.msra.mxu1 %v3046_v46 }
 0x605   :  { %1654 = vmatprep.subr.bf16.mxu0 %v3049_v47  ;;  %1695 = vmatprep.subr.bf16.mxu1 %v3709_v54 }
 0x608   :  { %1655 = vmatpush1.bf16.msra.mxu0 %v3710_v59  ;;  %1696 = vmatpush1.bf16.msra.mxu1 %v3711_v52 }
 0x609   :  { %1656 = vmatprep.subr.bf16.mxu0 %v3712_v50  ;;  %1697 = vmatprep.subr.bf16.mxu1 %v3713_v49  ;;  %v3724_v49 = vld [vmem:[#allocation32_spill] sm:$0xff] }
 0x60c   :  { %1657 = vmatpush1.bf16.msra.mxu0 %v3714_v51  ;;  %1698 = vmatpush1.bf16.msra.mxu1 %v3715_v14  ;;  %v3725_v51 = vld [vmem:[#allocation33_spill] sm:$0xff]  ;;  %v3726_v14 = vld [vmem:[#allocation34_spill] sm:$0xff] }
 0x60d   :  { %1658 = vmatprep.subr.bf16.mxu0 %v3716_v19  ;;  %1699 = vmatprep.subr.bf16.mxu1 %v3717_v53  ;;  %v3727_v19 = vld [vmem:[#allocation35_spill] sm:$0xff]  ;;  %v3728_v53 = vld [vmem:[#allocation36_spill] sm:$0xff] }
 0x610   :  { %1659 = vmatpush1.bf16.msra.mxu0 %v3718_v61  ;;  %1700 = vmatpush1.bf16.msra.mxu1 %v3719_v33  ;;  %v3729_v61 = vld [vmem:[#allocation37_spill] sm:$0xff] }
 0x611   :  { %1660 = vmatprep.subr.bf16.mxu0 %v3720_v9  ;;  %1701 = vmatprep.subr.bf16.mxu1 %v3721_v8 }
 0x614   :  { %1661 = vmatpush1.bf16.msra.mxu0 %v3722_v17  ;;  %1702 = vmatpush1.bf16.msra.mxu1 %v3723_v26 }
 0x615   :  { %1662 = vmatprep.subr.bf16.mxu0 %v3724_v49  ;;  %1703 = vmatprep.subr.bf16.mxu1 %v3725_v51 }
 0x618   :  { %1663 = vmatpush1.bf16.msra.mxu0 %v3726_v14  ;;  %1704 = vmatpush1.bf16.msra.mxu1 %v3727_v19 }
 0x619   :  { %1730 = vmatprep.subr.bf16.mxu0 %v3728_v53  ;;  %1771 = vmatprep.subr.bf16.mxu1 %v3729_v61 }
 0x69b   :  { %v1485_v33 = vpop.f32.mrf.mxu0  ;;  %v1526_v9 = vpop.f32.mrf.mxu1 }
 0x69d   :  { %v1487_v50 = vpop.f32.mrf.mxu0  ;;  %v1528_v8 = vpop.f32.mrf.mxu1 }
 0x69f   :  { %v1489_v52 = vpop.f32.mrf.mxu0  ;;  %v1530_v17 = vpop.f32.mrf.mxu1 }
 0x6a1   :  { %v1490_v59 = vpop.f32.mrf.mxu0  ;;  %v1531_v26 = vpop.f32.mrf.mxu1 }
 0x6bb   :  { %v1567_v54 = vpop.f32.mrf.mxu0  ;;  %v1608_v49 = vpop.f32.mrf.mxu1 }
 0x6bc   :  { %v1568_v47 = vadd.f32 %v1567_v54, %v1485_v33  ;;  %v1609_v26 = vadd.f32 %v1608_v49, %v1526_v9 }
 0x6bd   :  { %v1569_v51 = vpop.f32.mrf.mxu0  ;;  %v1610_v46 = vpop.f32.mrf.mxu1 }
 0x6be   :  { %v1615_v14 = vadd.f32 %v1568_v47, %v2812_v30  ;;  %v1570_v19 = vadd.f32 %v1569_v51, %v1487_v50  ;;  %v1611_v59 = vadd.f32 %v1610_v46, %v1528_v8  ;;  %v1617_v41 = vadd.f32 %v1609_v26, %v2821_v10  ;;  %v3740_v26 = vld [vmem:[#allocation20_spill] sm:$0xff] }
 0x6bf   :  { %v1571_v45 = vpop.f32.mrf.mxu0  ;;  %v1612_v53 = vpop.f32.mrf.mxu1 }
 0x6c0   :  { %v2137_v44 = vmul.f32 -1.442695, %v1615_v14  ;;  %v1616_v61 = vadd.f32 %v1570_v19, %v2814_v18  ;;  %v1618_v17 = vadd.f32 %v1611_v59, %v2818_v11  ;;  %v3734_v59 = vld [vmem:[#allocation14_spill] sm:$0xff] }
 0x6c1   :  { %v1572_v43 = vpop.f32.mrf.mxu0  ;;  %v1613_v42 = vpop.f32.mrf.mxu1 }
 0x6c2   :  { %2331 = vpow2.f32 %v2137_v44  ;;  %v2138_v52 = vmul.f32 -1.442695, %v1616_v61  ;;  %v2139_v54 = vmul.f32 -1.442695, %v1618_v17  ;;  %v3739_v17 = vld [vmem:[#allocation19_spill] sm:$0xff] }
 0x6c4   :  { %2333 = vpow2.f32 %v2138_v52  ;;  %v3731_v52 = vld [vmem:[#allocation41_spill] sm:$0xff] }
 0x6c5   :  { %2335 = vpow2.f32 %v2139_v54  ;;  %v3741_v54 = vld [vmem:[#allocation21_spill] sm:$0xff] }
 0x6cf   :  { %v2332_v33 = vpop.eup %2331 }
 0x6d0   :  { %v1622_v47 = vadd.f32 1.0, %v2332_v33  ;;  %v3742_v33 = vld [vmem:[#allocation22_spill] sm:$0xff] }
 0x6d1   :  { %v2334_v50 = vpop.eup %2333 }
 0x6d2   :  { %2337 = vrcp.f32 %v1622_v47  ;;  %v1628_v45 = vadd.f32 1.0, %v2334_v50  ;;  %v2336_v43 = vpop.eup %2335  ;;  %v3743_v47 = vld [vmem:[#allocation23_spill] sm:$0xff]  ;;  %v3744_v50 = vld [vmem:[#allocation24_spill] sm:$0xff] }
 0x6d3   :  { %2339 = vtanh.f32 %v1617_v41  ;;  %v1635_v14 = vadd.f32 1.0, %v2336_v43  ;;  %v1647_v41 = vld [vmem:[#allocation2 + $0x18] sm:$0xf]  ;;  %v3746_v43 = vld [vmem:[#allocation26_spill] sm:$0xff] }
 0x6d4   :  { %2341 = vrcp.f32 %v1628_v45  ;;  %v3745_v45 = vld [vmem:[#allocation25_spill] sm:$0xff] }
 0x6d5   :  { %2343 = vrcp.f32 %v1635_v14  ;;  %v3750_v14 = vld [vmem:[#allocation30_spill] sm:$0xff] }
 0x6df   :  { %v2338_v42 = vpop.eup %2337 }
 0x6e0   :  { %v2340_v44 = vpop.eup %2339 }
 0x6e1   :  { %v2342_v51 = vpop.eup %2341  ;;  %v1639_v46 = vmul.f32 %v2340_v44, %v2338_v42  ;;  %v3747_v42 = vld [vmem:[#allocation27_spill] sm:$0xff]  ;;  %v3748_v44 = vld [vmem:[#allocation28_spill] sm:$0xff] }
 0x6e2   :  { %v1638_v19 = vmul.f32 %v2342_v51, %v3256_v60  ;;  %v2344_v53 = vpop.eup %2343  ;;  %v3730_v60 = vld [vmem:[#allocation40_spill] sm:$0xff]  ;;  %v3749_v51 = vld [vmem:[#allocation29_spill] sm:$0xff] }
 0x6e4   :  { %v3332_v49 = vadd.f32 %v1639_v46, %v1638_v19  ;;  %v3751_v46 = vld [vmem:[#allocation31_spill] sm:$0xff]  ;;  %v3752_v19 = vld [vmem:[#allocation32_spill] sm:$0xff] }
 0x6e6   :  { %2345 = vtanh.f32 %v3332_v49 }
 0x6f3   :  { %v2346_v61 = vpop.eup %2345 }
 0x6f4   :  { %v1642_v9 = vmul.f32 %v2346_v61, %v2344_v53  ;;  %v3753_v53 = vld [vmem:[#allocation33_spill] sm:$0xff]  ;;  %v3754_v61 = vld [vmem:[#allocation34_spill] sm:$0xff] }
 0x6f6   :  { %v1643_v8 = vpack.c.bf16 %v1642_v9, %v1642_v9  ;;  %v3755_v9 = vld [vmem:[#allocation35_spill] sm:$0xff] }
 0x6f8   :  { %1645 = vst [vmem:[#allocation8 + $0x14] sm:$0xf] %v1643_v8  ;;  %1681 = vmatmul.mubr.bf16.vlgmr.msra.gmra.mxu0 %v1643_v8  ;;  %1722 = vmatmul.mubr.bf16.vlgmr.msra.gmra.mxu1 %v1643_v8  ;;  %v3756_v8 = vld [vmem:[#allocation36_spill] sm:$0xff] }
 0x6f9   :  { %1731 = vmatpush1.bf16.msra.mxu0 %v3123_v20  ;;  %1772 = vmatpush1.bf16.msra.mxu1 %v3126_v25 }
 0x6fa   :  { %1732 = vmatprep.subr.bf16.mxu0 %v3129_v12  ;;  %1773 = vmatprep.subr.bf16.mxu1 %v3132_v22 }
 0x6fb   :  { %1762 = vmatprep.mubr.bf16.mxu0 %v3611_v62  ;;  %1803 = vmatprep.mubr.bf16.mxu1 %v3611_v62 }
 0x6fd   :  { %1733 = vmatpush1.bf16.msra.mxu0 %v3137_v13  ;;  %1774 = vmatpush1.bf16.msra.mxu1 %v3140_v35 }
 0x6fe   :  { %1734 = vmatprep.subr.bf16.mxu0 %v3143_v29  ;;  %1775 = vmatprep.subr.bf16.mxu1 %v3146_v15 }
 0x701   :  { %1735 = vmatpush1.bf16.msra.mxu0 %v3149_v31  ;;  %1776 = vmatpush1.bf16.msra.mxu1 %v3152_v34 }
 0x702   :  { %1736 = vmatprep.subr.bf16.mxu0 %v3155_v21  ;;  %1777 = vmatprep.subr.bf16.mxu1 %v3158_v24 }
 0x705   :  { %1737 = vmatpush1.bf16.msra.mxu0 %v3161_v7  ;;  %1778 = vmatpush1.bf16.msra.mxu1 %v3164_v1 }
 0x706   :  { %1738 = vmatprep.subr.bf16.mxu0 %v3167_v28  ;;  %1779 = vmatprep.subr.bf16.mxu1 %v3170_v4 }
 0x709   :  { %1739 = vmatpush1.bf16.msra.mxu0 %v3173_v5  ;;  %1780 = vmatpush1.bf16.msra.mxu1 %v3176_v6 }
 0x70a   :  { %1740 = vmatprep.subr.bf16.mxu0 %v3702_v48  ;;  %1781 = vmatprep.subr.bf16.mxu1 %v3703_v16 }
 0x70d   :  { %1741 = vmatpush1.bf16.msra.mxu0 %v3704_v57  ;;  %1782 = vmatpush1.bf16.msra.mxu1 %v3705_v56 }
 0x70e   :  { %1742 = vmatprep.subr.bf16.mxu0 %v3706_v63  ;;  %1783 = vmatprep.subr.bf16.mxu1 %v3707_v32 }
 0x711   :  { %1743 = vmatpush1.bf16.msra.mxu0 %v3708_v55  ;;  %1784 = vmatpush1.bf16.msra.mxu1 %v3200_v3 }
 0x712   :  { %1744 = vmatprep.subr.bf16.mxu0 %v3203_v23  ;;  %1785 = vmatprep.subr.bf16.mxu1 %v3206_v58 }
 0x715   :  { %1745 = vmatpush1.bf16.msra.mxu0 %v3209_v2  ;;  %1786 = vmatpush1.bf16.msra.mxu1 %v3212_v27 }
 0x716   :  { %1845 = vmatprep.subr.bf16.mxu0 %v3011_v36  ;;  %1886 = vmatprep.subr.bf16.mxu1 %v3014_v37  ;;  %v3732_v36 = vld [vmem:[#allocation12_spill] sm:$0xff]  ;;  %v3733_v37 = vld [vmem:[#allocation13_spill] sm:$0xff] }
 0x718   :  { %1763 = vmatmul.mubr.bf16.vlgmr.msra.gmra.mxu0 %v1647_v41  ;;  %1804 = vmatmul.mubr.bf16.vlgmr.msra.gmra.mxu1 %v1647_v41  ;;  %v3757_v41 = vld [vmem:[#allocation37_spill] sm:$0xff] }
 0x719   :  { %1846 = vmatpush1.bf16.msra.mxu0 %v3017_v38  ;;  %1887 = vmatpush1.bf16.msra.mxu1 %v3020_v39  ;;  %v3735_v38 = vld [vmem:[#allocation15_spill] sm:$0xff]  ;;  %v3736_v39 = vld [vmem:[#allocation16_spill] sm:$0xff] }
 0x71a   :  { %1847 = vmatprep.subr.bf16.mxu0 %v3023_v0  ;;  %1888 = vmatprep.subr.bf16.mxu1 %v3026_v40  ;;  %v3737_v0 = vld [vmem:[#allocation17_spill] sm:$0xff]  ;;  %v3738_v40 = vld [vmem:[#allocation18_spill] sm:$0xff] }
 0x71b   :  { %1877 = vmatprep.mubr.bf16.mxu0 %v3611_v62  ;;  %1918 = vmatprep.mubr.bf16.mxu1 %v3611_v62 }
 0x71d   :  { %1848 = vmatpush1.bf16.msra.mxu0 %v3730_v60  ;;  %1889 = vmatpush1.bf16.msra.mxu1 %v3731_v52 }
 0x71e   :  { %1849 = vmatprep.subr.bf16.mxu0 %v3732_v36  ;;  %1890 = vmatprep.subr.bf16.mxu1 %v3733_v37 }
 0x721   :  { %1850 = vmatpush1.bf16.msra.mxu0 %v3734_v59  ;;  %1891 = vmatpush1.bf16.msra.mxu1 %v3735_v38 }
 0x722   :  { %1851 = vmatprep.subr.bf16.mxu0 %v3736_v39  ;;  %1892 = vmatprep.subr.bf16.mxu1 %v3737_v0 }
 0x725   :  { %1852 = vmatpush1.bf16.msra.mxu0 %v3738_v40  ;;  %1893 = vmatpush1.bf16.msra.mxu1 %v3739_v17 }
 0x726   :  { %1853 = vmatprep.subr.bf16.mxu0 %v3740_v26  ;;  %1894 = vmatprep.subr.bf16.mxu1 %v3741_v54 }
 0x729   :  { %1854 = vmatpush1.bf16.msra.mxu0 %v3742_v33  ;;  %1895 = vmatpush1.bf16.msra.mxu1 %v3743_v47 }
 0x72a   :  { %1855 = vmatprep.subr.bf16.mxu0 %v3744_v50  ;;  %1896 = vmatprep.subr.bf16.mxu1 %v3745_v45 }
 0x72d   :  { %1856 = vmatpush1.bf16.msra.mxu0 %v3746_v43  ;;  %1897 = vmatpush1.bf16.msra.mxu1 %v3747_v42 }
 0x72e   :  { %1857 = vmatprep.subr.bf16.mxu0 %v3748_v44  ;;  %1898 = vmatprep.subr.bf16.mxu1 %v3749_v51 }
 0x731   :  { %1858 = vmatpush1.bf16.msra.mxu0 %v3750_v14  ;;  %1899 = vmatpush1.bf16.msra.mxu1 %v3751_v46 }
 0x732   :  { %1859 = vmatprep.subr.bf16.mxu0 %v3752_v19  ;;  %1900 = vmatprep.subr.bf16.mxu1 %v3753_v53 }
 0x735   :  { %1860 = vmatpush1.bf16.msra.mxu0 %v3754_v61  ;;  %1901 = vmatpush1.bf16.msra.mxu1 %v3755_v9 }
 0x736   :  { %1927 = vmatprep.subr.bf16.mxu0 %v3756_v8  ;;  %1968 = vmatprep.subr.bf16.mxu1 %v3757_v41 }
 0x7b8   :  { %v1682_v60 = vpop.f32.mrf.mxu0  ;;  %v1723_v52 = vpop.f32.mrf.mxu1 }
 0x7ba   :  { %v1684_v36 = vpop.f32.mrf.mxu0  ;;  %v1725_v37 = vpop.f32.mrf.mxu1 }
 0x7bc   :  { %v1686_v59 = vpop.f32.mrf.mxu0  ;;  %v1727_v38 = vpop.f32.mrf.mxu1 }
 0x7be   :  { %v1687_v39 = vpop.f32.mrf.mxu0  ;;  %v1728_v0 = vpop.f32.mrf.mxu1 }
 0x7d8   :  { %v1764_v40 = vpop.f32.mrf.mxu0  ;;  %v1805_v17 = vpop.f32.mrf.mxu1 }
 0x7d9   :  { %v1765_v26 = vadd.f32 %v1764_v40, %v1682_v60  ;;  %v1806_v61 = vadd.f32 %v1805_v17, %v1723_v52 }
 0x7da   :  { %v1766_v54 = vpop.f32.mrf.mxu0  ;;  %v1807_v33 = vpop.f32.mrf.mxu1 }
 0x7db   :  { %v1812_v47 = vadd.f32 %v1765_v26, %v2812_v30  ;;  %v1767_v50 = vadd.f32 %v1766_v54, %v1684_v36  ;;  %v1808_v19 = vadd.f32 %v1807_v33, %v1725_v37  ;;  %v1814_v41 = vadd.f32 %v1806_v61, %v2821_v10 }
 0x7dc   :  { %v1768_v45 = vpop.f32.mrf.mxu0  ;;  %v1809_v43 = vpop.f32.mrf.mxu1 }
 0x7dd   :  { %v2140_v42 = vmul.f32 -1.442695, %v1812_v47  ;;  %v1813_v44 = vadd.f32 %v1767_v50, %v2814_v18  ;;  %v1815_v53 = vadd.f32 %v1808_v19, %v2818_v11 }
 0x7de   :  { %v1769_v51 = vpop.f32.mrf.mxu0  ;;  %v1810_v14 = vpop.f32.mrf.mxu1 }
 0x7df   :  { %2347 = vpow2.f32 %v2140_v42  ;;  %v2141_v46 = vmul.f32 -1.442695, %v1813_v44  ;;  %v2142_v9 = vmul.f32 -1.442695, %v1815_v53 }
 0x7e1   :  { %2349 = vpow2.f32 %v2141_v46 }
 0x7e2   :  { %2351 = vpow2.f32 %v2142_v9 }
 0x7ec   :  { %v2348_v8 = vpop.eup %2347 }
 0x7ed   :  { %v1819_v60 = vadd.f32 1.0, %v2348_v8 }
 0x7ee   :  { %v2350_v36 = vpop.eup %2349 }
 0x7ef   :  { %2353 = vrcp.f32 %v1819_v60  ;;  %v1825_v59 = vadd.f32 1.0, %v2350_v36  ;;  %v2352_v38 = vpop.eup %2351 }
 0x7f0   :  { %2355 = vtanh.f32 %v1814_v41  ;;  %v1832_v26 = vadd.f32 1.0, %v2352_v38 }
 0x7f1   :  { %2357 = vrcp.f32 %v1825_v59 }
 0x7f2   :  { %2359 = vrcp.f32 %v1832_v26 }
 0x7fc   :  { %v2354_v39 = vpop.eup %2353 }
 0x7fd   :  { %v2356_v0 = vpop.eup %2355 }
 0x7fe   :  { %v2358_v40 = vpop.eup %2357  ;;  %v1836_v37 = vmul.f32 %v2356_v0, %v2354_v39 }
 0x7ff   :  { %v1835_v54 = vmul.f32 %v2358_v40, %v3332_v49  ;;  %v2360_v17 = vpop.eup %2359 }
 0x801   :  { %v3408_v52 = vadd.f32 %v1836_v37, %v1835_v54 }
 0x803   :  { %2361 = vtanh.f32 %v3408_v52 }
 0x810   :  { %v2362_v33 = vpop.eup %2361 }
 0x811   :  { %v1839_v47 = vmul.f32 %v2362_v33, %v2360_v17 }
 0x813   :  { %v1840_v50 = vpack.c.bf16 %v1839_v47, %v1839_v47 }
 0x815   :  { %1842 = vst [vmem:[#allocation8 + $0x18] sm:$0xf] %v1840_v50  ;;  %1878 = vmatmul.mubr.bf16.vlgmr.msra.gmra.mxu0 %v1840_v50  ;;  %1919 = vmatmul.mubr.bf16.vlgmr.msra.gmra.mxu1 %v1840_v50 }
 0x816   :  { %1928 = vmatpush1.bf16.msra.mxu0 %v3123_v20  ;;  %1969 = vmatpush1.bf16.msra.mxu1 %v3126_v25 }
 0x817   :  { %1929 = vmatprep.subr.bf16.mxu0 %v3129_v12  ;;  %1970 = vmatprep.subr.bf16.mxu1 %v3132_v22 }
 0x818   :  { %1959 = vmatprep.mubr.bf16.mxu0 %v3611_v62  ;;  %2000 = vmatprep.mubr.bf16.mxu1 %v3611_v62  ;;  %v1844_v62 = vld [vmem:[#allocation2 + $0x1c] sm:$0xf] }
 0x81a   :  { %1930 = vmatpush1.bf16.msra.mxu0 %v3137_v13  ;;  %1971 = vmatpush1.bf16.msra.mxu1 %v3140_v35 }
 0x81b   :  { %1931 = vmatprep.subr.bf16.mxu0 %v3143_v29  ;;  %1972 = vmatprep.subr.bf16.mxu1 %v3146_v15 }
 0x81e   :  { %1932 = vmatpush1.bf16.msra.mxu0 %v3149_v31  ;;  %1973 = vmatpush1.bf16.msra.mxu1 %v3152_v34 }
 0x81f   :  { %1933 = vmatprep.subr.bf16.mxu0 %v3155_v21  ;;  %1974 = vmatprep.subr.bf16.mxu1 %v3158_v24 }
 0x822   :  { %1934 = vmatpush1.bf16.msra.mxu0 %v3161_v7  ;;  %1975 = vmatpush1.bf16.msra.mxu1 %v3164_v1 }
 0x823   :  { %1935 = vmatprep.subr.bf16.mxu0 %v3167_v28  ;;  %1976 = vmatprep.subr.bf16.mxu1 %v3170_v4 }
 0x826   :  { %1936 = vmatpush1.bf16.msra.mxu0 %v3173_v5  ;;  %1977 = vmatpush1.bf16.msra.mxu1 %v3176_v6 }
 0x827   :  { %1937 = vmatprep.subr.bf16.mxu0 %v3702_v48  ;;  %1978 = vmatprep.subr.bf16.mxu1 %v3703_v16 }
 0x82a   :  { %1938 = vmatpush1.bf16.msra.mxu0 %v3704_v57  ;;  %1979 = vmatpush1.bf16.msra.mxu1 %v3705_v56 }
 0x82b   :  { %1939 = vmatprep.subr.bf16.mxu0 %v3706_v63  ;;  %1980 = vmatprep.subr.bf16.mxu1 %v3707_v32 }
 0x82e   :  { %1940 = vmatpush1.bf16.msra.mxu0 %v3708_v55  ;;  %1981 = vmatpush1.bf16.msra.mxu1 %v3200_v3 }
 0x82f   :  { %1941 = vmatprep.subr.bf16.mxu0 %v3203_v23  ;;  %1982 = vmatprep.subr.bf16.mxu1 %v3206_v58 }
 0x832   :  { %1942 = vmatpush1.bf16.msra.mxu0 %v3209_v2  ;;  %1983 = vmatpush1.bf16.msra.mxu1 %v3212_v27 }
 0x835   :  { %1960 = vmatmul.mubr.bf16.vlgmr.msra.gmra.mxu0 %v1844_v62  ;;  %2001 = vmatmul.mubr.bf16.vlgmr.msra.gmra.mxu1 %v1844_v62 }
 0x8d5   :  { %v1879_v20 = vpop.f32.mrf.mxu0  ;;  %v1920_v25 = vpop.f32.mrf.mxu1 }
 0x8d7   :  { %v1881_v12 = vpop.f32.mrf.mxu0  ;;  %v1922_v22 = vpop.f32.mrf.mxu1 }
 0x8d9   :  { %v1883_v13 = vpop.f32.mrf.mxu0  ;;  %v1924_v35 = vpop.f32.mrf.mxu1 }
 0x8db   :  { %v1884_v29 = vpop.f32.mrf.mxu0  ;;  %v1925_v15 = vpop.f32.mrf.mxu1 }
 0x8f5   :  { %v1961_v31 = vpop.f32.mrf.mxu0  ;;  %v2002_v34 = vpop.f32.mrf.mxu1 }
 0x8f6   :  { %v1962_v21 = vadd.f32 %v1961_v31, %v1879_v20  ;;  %v2003_v16 = vadd.f32 %v2002_v34, %v1920_v25 }
 0x8f7   :  { %v1963_v24 = vpop.f32.mrf.mxu0  ;;  %v2004_v7 = vpop.f32.mrf.mxu1 }
 0x8f8   :  { %v2009_v1 = vadd.f32 %v1962_v21, %v2812_v30  ;;  %v1964_v28 = vadd.f32 %v1963_v24, %v1881_v12  ;;  %v2005_v27 = vadd.f32 %v2004_v7, %v1922_v22  ;;  %v2011_v63 = vadd.f32 %v2003_v16, %v2821_v10 }
 0x8f9   :  { %v1965_v4 = vpop.f32.mrf.mxu0  ;;  %v2006_v5 = vpop.f32.mrf.mxu1 }
 0x8fa   :  { %v2143_v6 = vmul.f32 -1.442695, %v2009_v1  ;;  %v2010_v3 = vadd.f32 %v1964_v28, %v2814_v18  ;;  %v2012_v48 = vadd.f32 %v2005_v27, %v2818_v11 }
 0x8fb   :  { %v1966_v23 = vpop.f32.mrf.mxu0  ;;  %v2007_v58 = vpop.f32.mrf.mxu1 }
 0x8fc   :  { %2363 = vpow2.f32 %v2143_v6  ;;  %v2144_v2 = vmul.f32 -1.442695, %v2010_v3  ;;  %v2145_v57 = vmul.f32 -1.442695, %v2012_v48 }
 0x8fe   :  { %2365 = vpow2.f32 %v2144_v2 }
 0x8ff   :  { %2367 = vpow2.f32 %v2145_v57 }
 0x909   :  { %v2364_v56 = vpop.eup %2363 }
 0x90a   :  { %v2016_v30 = vadd.f32 1.0, %v2364_v56 }
 0x90b   :  { %v2366_v32 = vpop.eup %2365 }
 0x90c   :  { %2369 = vrcp.f32 %v2016_v30  ;;  %v2022_v55 = vadd.f32 1.0, %v2366_v32  ;;  %v2368_v18 = vpop.eup %2367 }
 0x90d   :  { %2371 = vtanh.f32 %v2011_v63  ;;  %v2029_v42 = vadd.f32 1.0, %v2368_v18 }
 0x90e   :  { %2373 = vrcp.f32 %v2022_v55 }
 0x90f   :  { %2375 = vrcp.f32 %v2029_v42 }
 0x919   :  { %v2370_v49 = vpop.eup %2369 }
 0x91a   :  { %v2372_v45 = vpop.eup %2371 }
 0x91b   :  { %v2374_v43 = vpop.eup %2373  ;;  %v2033_v44 = vmul.f32 %v2372_v45, %v2370_v49 }
 0x91c   :  { %v2032_v11 = vmul.f32 %v2374_v43, %v3408_v52  ;;  %v2376_v14 = vpop.eup %2375 }
 0x91e   :  { %v2034_v51 = vadd.f32 %v2033_v44, %v2032_v11 }
 0x920   :  { %2377 = vtanh.f32 %v2034_v51 }
 0x92d   :  { %v2378_v10 = vpop.eup %2377 }
 0x92e   :  { %v2036_v46 = vmul.f32 %v2378_v10, %v2376_v14 }
 0x930   :  { %v2037_v19 = vpack.c.bf16 %v2036_v46, %v2036_v46 }
 0x932   :  { %2039 = vst [vmem:[#allocation8 + $0x1c] sm:$0xf] %v2037_v19 }
 0x933   :  { %2514 = shalt.err (!%p2511_p5)
}
 0x934   :  { %2051 = dma.vmem_to_hbm [thread:$0]  %s2046_s7, 512, %s3458_s4, [#allocation4], %s2533_s25, %s2533_s25, %s2534_s26  }
 0x935   :  { %2527 = dma.done.wait [#allocation4], 512  }
 0x936   :  { %2528 = vsyncadd [#allocation4], 4294966784 }
 0x937   :  { %2055 = vsyncpa [#allocation3], 1 }
 0x938   :  { %2056 = vsyncpa [#allocation6], 1 }
 0x939   :  { %2057 = vsyncpa [#allocation4], 1 }

</bundles_post_ra>
